<compile_context>
chip_gen: v5e
topology: v5e:2x2
jax: 0.10.0
libtpu: 0.0.40
codegen_flags: <defaults>
</compile_context>

<pallas_src>
import math

import jax
import jax.numpy as jnp
from jax import lax
from jax.experimental import pallas as pl
from jax.experimental.pallas import tpu as pltpu

# ----------------------------- config ---------------------------------------
B = 2          # batch
S = 8          # sequence length
H = 32         # hidden size
NH = 4         # multi_head
DH = H // NH   # per-head dim
FF = 64        # ff_size
EPS = 1e-6
NEG_INF = -1e9

# ------------------- packed-operand layout (shared weights) ------------------
WPW = max(H + 1, FF)          # lane width of the packed arrays (= 64)
R_QKV = 0                     # rows [0, 3H):    [Wq^T|bq ; Wk^T|bk ; Wv^T|bv]
R_M = 3 * H                   # rows [3H, 4H):   W_merge (in, out)
R_F1 = 4 * H                  # rows [4H, 5H):   W_ffn1  (in, out)
R_F2 = 5 * H                  # rows [5H, 5H+FF): W_ffn2 (in, out)
W_ROWS = 5 * H + FF           # 224

# rows of the packed bias / LayerNorm-parameter array
V_BM, V_BF1, V_BF2, V_L1A, V_L1B, V_L2A, V_L2B = range(7)
V_ROWS = 8


# ----------------------------- kernel ---------------------------------------
def _cond_layernorm(x, gamma, beta):
    """torch LayerNorm as used in this model: unbiased std, eps added to std.

    Uses two *independent* lane reductions (sum, sum-of-squares) so they can
    co-issue on the XLU instead of the serial reduce->sub->square->reduce chain.
    Divides are exact (no approx reciprocal) for f32 parity with PyTorch.
    """
    ssum = jnp.sum(x, axis=-1, keepdims=True)
    ssq = jnp.sum(x * x, axis=-1, keepdims=True)
    mean = ssum * (1.0 / H)
    var = (ssq - ssum * mean) * (1.0 / (H - 1))
    std = jnp.sqrt(jnp.maximum(var, 0.0))
    return gamma * (x - mean) / (std + EPS) + beta


def sag_kernel(y_ref, mask_ref, cond_ref, w_ref, v_ref, out_ref):
    bb = y_ref.shape[0]                      # batch elements in this grid step

    # Invariant weight / bias views -- hoisted out of the per-batch loop.
    w_qkv = w_ref[R_QKV:R_M, 0:H]            # (3H, H)  rows = output features
    b_qkv = w_ref[R_QKV:R_M, H:H + 1]        # (3H, 1)  QKV bias column
    w_m = w_ref[R_M:R_F1, 0:H]               # (H, H)   (in, out)
    w_f1 = w_ref[R_F1:R_F2, 0:FF]            # (H, FF)
    w_f2 = w_ref[R_F2:W_ROWS, 0:H]           # (FF, H)
    b_m = v_ref[V_BM:V_BM + 1, 0:H]          # (1, H)
    b_f1 = v_ref[V_BF1:V_BF1 + 1, 0:FF]
    b_f2 = v_ref[V_BF2:V_BF2 + 1, 0:H]
    l1a = v_ref[V_L1A:V_L1A + 1, 0:H]
    l1b = v_ref[V_L1B:V_L1B + 1, 0:H]
    l2a = v_ref[V_L2A:V_L2A + 1, 0:H]
    l2b = v_ref[V_L2B:V_L2B + 1, 0:H]
    scale = 1.0 / math.sqrt(DH)

    # Unrolled loop over the batch elements of this block; the per-batch chains
    # are independent so the VLIW scheduler interleaves them.
    for b in range(bb):
        y = y_ref[b]                          # (S, H)
        masked = mask_ref[b] > 0              # (1, S)  True => masked key
        c = cond_ref[b]                       # (4, H)  rows [g1, b1, g2, b2]

        # Fused QKV projection, feature-major, no explicit transpose:
        #   qkvT[o, s] = sum_i Wqkv[o, i] * y[s, i] + bqkv[o]
        qkvT = lax.dot_general(
            w_qkv, y, (((1,), (1,)), ((), ())),
            preferred_element_type=jnp.float32) + b_qkv          # (3H, S)

        # Head split: pure reindexing of 8-row sublane groups (free reshape).
        q3 = qkvT[0:H].reshape(NH, DH, S)
        k3 = qkvT[H:2 * H].reshape(NH, DH, S)
        v3 = qkvT[2 * H:3 * H].reshape(NH, DH, S)

        # All-head attention scores + masked softmax (keys on the lane axis).
        s3 = jnp.einsum("hds,hdt->hst", q3, k3,
                        preferred_element_type=jnp.float32) * scale   # (NH, S, S)
        s3 = jnp.where(masked[None], NEG_INF, s3)
        mmax = jnp.max(s3, axis=-1, keepdims=True)
        p = jnp.exp(s3 - mmax)
        p = p / jnp.sum(p, axis=-1, keepdims=True)   # exact divide (f32 parity)

        # Per-head context (feature-major) then merge projection.
        ctx3 = jnp.einsum("hdt,hst->hds", v3, p,
                          preferred_element_type=jnp.float32)          # (NH, DH, S)
        ctxT = ctx3.reshape(H, S)
        atted = lax.dot_general(
            ctxT, w_m, (((0,), (0,)), ((), ())),
            preferred_element_type=jnp.float32) + b_m                  # (S, H)

        # Residual + conditional LayerNorm 1.
        y1 = _cond_layernorm(y + atted, l1a + c[0:1], l1b + c[1:2])

        # FFN: Linear -> ReLU -> Linear (dropout = identity in eval mode).
        h1 = jnp.maximum(
            jnp.dot(y1, w_f1, preferred_element_type=jnp.float32) + b_f1, 0.0)
        ffo = jnp.dot(h1, w_f2, preferred_element_type=jnp.float32) + b_f2

        # Residual + conditional LayerNorm 2.
        y2 = _cond_layernorm(y1 + ffo, l2a + c[2:3], l2b + c[3:4])
        out_ref[b] = y2.astype(out_ref.dtype)


# ----------------------------- wrapper ---------------------------------------
def _multi_core_chip():
    """True on chips with >=2 TensorCores per chip (v7x); False otherwise."""
    try:
        kind = jax.devices()[0].device_kind.lower().replace(" ", "")
    except Exception:
        return False
    return ("v7" in kind) or ("7x" in kind)


# v5e/v6e (single TC): fold whole batch into one grid step.
# v7x (2 TCs): one batch element per grid step, sharded across cores.
_BATCH_PER_STEP = 1 if (_multi_core_chip() and B > 1) else B


def pack_sag_params(params):
    """Pack the 16 tiny parameter arrays into 2 operands.  Call ONCE at
    parameter-load time; do not call per forward pass."""
    (wq, bq, wk, bk, wv, bv, wm, bm, w1, bf1, w2, bf2,
     ln1a, ln1b, ln2a, ln2b) = params

    assert WPW >= H + 1 and WPW >= FF, "packed lane width too small"
    for w, shp in ((wq, (H, H)), (wk, (H, H)), (wv, (H, H)), (wm, (H, H)),
                   (w1, (H, FF)), (w2, (FF, H))):
        assert w.shape == shp, (w.shape, shp)

    def pad_cols(a):
        return jnp.pad(a, ((0, 0), (0, WPW - a.shape[1])))

    # (3H, H+1): rows = output features, column H = bias.  Columns > H are
    # zero-padded and never read by the kernel.
    qkv = jnp.concatenate([
        jnp.concatenate([wq.T, bq.T], axis=1),
        jnp.concatenate([wk.T, bk.T], axis=1),
        jnp.concatenate([wv.T, bv.T], axis=1)], axis=0)
    w_packed = jnp.concatenate(
        [pad_cols(qkv), pad_cols(wm), pad_cols(w1), pad_cols(w2)], axis=0)

    v_packed = jnp.concatenate(
        [pad_cols(bm), pad_cols(bf1), pad_cols(bf2),
         pad_cols(ln1a), pad_cols(ln1b), pad_cols(ln2a), pad_cols(ln2b),
         jnp.zeros((1, WPW), jnp.float32)], axis=0)

    assert w_packed.shape == (W_ROWS, WPW), w_packed.shape
    assert v_packed.shape == (V_ROWS, WPW), v_packed.shape
    return w_packed, v_packed


@jax.jit
def sag_forward(y, y_mask, cond4, w_packed, v_packed):
    """y:(B,S,H)  y_mask:(B,1,S)  cond4:(B,4,H)  w/v_packed: pre-packed params."""
    bb = _BATCH_PER_STEP
    in_specs = [
        pl.BlockSpec((bb, S, H), lambda i: (i, 0, 0)),        # y     (per block)
        pl.BlockSpec((bb, 1, S), lambda i: (i, 0, 0)),        # mask
        pl.BlockSpec((bb, 4, H), lambda i: (i, 0, 0)),        # cond  [g1,b1,g2,b2]
        pl.BlockSpec((W_ROWS, WPW), lambda i: (0, 0)),        # packed weights
        pl.BlockSpec((V_ROWS, WPW), lambda i: (0, 0)),        # packed biases/LN
    ]
    return pl.pallas_call(
        sag_kernel,
        out_shape=jax.ShapeDtypeStruct((B, S, H), jnp.float32),
        grid=(B // bb,),
        in_specs=in_specs,
        out_specs=pl.BlockSpec((bb, S, H), lambda i: (i, 0, 0)),
        compiler_params=pltpu.CompilerParams(
            dimension_semantics=("parallel",)),
    )(y, y_mask, cond4, w_packed, v_packed)


# ----------------------------- pure-JAX reference -----------------------------
def sag_reference(y, y_mask, cond, params):
    (wq, bq, wk, bk, wv, bv, wm, bm, w1, bf1, w2, bf2,
     ln1a, ln1b, ln2a, ln2b) = params

    def layernorm(x, a2, b2, g, bb):
        mean = jnp.mean(x, axis=-1, keepdims=True)
        std = jnp.sqrt(jnp.sum((x - mean) ** 2, axis=-1, keepdims=True) / (H - 1))
        return (a2 + g[:, None, :]) * (x - mean) / (std + EPS) + (b2 + bb[:, None, :])

    q = (y @ wq + bq).reshape(B, S, NH, DH).transpose(0, 2, 1, 3)
    k = (y @ wk + bk).reshape(B, S, NH, DH).transpose(0, 2, 1, 3)
    v = (y @ wv + bv).reshape(B, S, NH, DH).transpose(0, 2, 1, 3)
    sc = jnp.einsum("bhqd,bhkd->bhqk", q, k) / math.sqrt(DH)
    m = (y_mask[:, :, None, :] > 0)                    # (B,1,1,S)
    sc = jnp.where(m, NEG_INF, sc)
    p = jax.nn.softmax(sc, axis=-1)
    att = jnp.einsum("bhqk,bhkd->bhqd", p, v).transpose(0, 2, 1, 3).reshape(B, S, H)
    att = att @ wm + bm

    g1, b1 = cond[:, 0 * H:1 * H], cond[:, 1 * H:2 * H]
    g2, b2 = cond[:, 2 * H:3 * H], cond[:, 3 * H:4 * H]

    y1 = layernorm(y + att, ln1a, ln1b, g1, b1)
    ff = jnp.maximum(y1 @ w1 + bf1, 0.0) @ w2 + bf2
    return layernorm(y1 + ff, ln2a, ln2b, g2, b2)


# ----------------------------- main -------------------------------------------
if __name__ == "__main__":
    key = jax.random.PRNGKey(0)
    keys = jax.random.split(key, 8)

    y = jax.random.normal(keys[0], (B, S, H), jnp.float32)
    cond = jax.random.normal(keys[1], (B, 4 * H), jnp.float32) * 0.1
    # mask: mark the last two key positions of batch 1 as masked
    y_mask = jnp.zeros((B, 1, S), jnp.int32).at[1, 0, -2:].set(1)

    def lin(k, fan_in, fan_out):
        w = jax.random.normal(k, (fan_in, fan_out), jnp.float32) * (1.0 / math.sqrt(fan_in))
        b = jnp.zeros((1, fan_out), jnp.float32)
        return w, b

    wq, bq = lin(keys[2], H, H)
    wk, bk = lin(keys[3], H, H)
    wv, bv = lin(keys[4], H, H)
    wm, bm = lin(keys[5], H, H)
    w1, bf1 = lin(keys[6], H, FF)
    w2, bf2 = lin(keys[7], FF, H)
    # deterministic non-zero biases / LN params so every path is exercised
    bq = bq + 0.01
    bk = bk - 0.015
    bv = bv + 0.025
    bm = bm - 0.02
    bf1 = bf1 + 0.03
    bf2 = bf2 - 0.01
    ln1a = jnp.ones((1, H), jnp.float32) + 0.05
    ln1b = jnp.zeros((1, H), jnp.float32) - 0.02
    ln2a = jnp.ones((1, H), jnp.float32) - 0.03
    ln2b = jnp.zeros((1, H), jnp.float32) + 0.01

    params = (wq, bq, wk, bk, wv, bv, wm, bm, w1, bf1, w2, bf2,
              ln1a, ln1b, ln2a, ln2b)

    # One-time packing (hoisted out of the forward pass, per perf review).
    w_packed, v_packed = pack_sag_params(params)
    w_packed = jax.block_until_ready(w_packed)
    v_packed = jax.block_until_ready(v_packed)
    cond4 = cond.reshape(B, 4, H)            # rows: [g1, b1, g2, b2]

    out = jax.block_until_ready(sag_forward(y, y_mask, cond4, w_packed, v_packed))
    ref = jax.block_until_ready(sag_reference(y, y_mask, cond, params))

    assert out.shape == (B, S, H)
    err = float(jnp.max(jnp.abs(out - ref)))
    # All arithmetic is exact f32 (approx reciprocal removed), so the kernel
    # should match the reference to a few ULPs; 1e-3 leaves ample headroom.
    assert err < 1e-3, f"max abs err = {err}"

    print("KERNEL_OK")
</pallas_src>

<mosaic_0001>
module attributes {stable_mosaic.version = 11 : i64} {
  func.func @sag_kernel(%arg0: i32, %arg1: memref<2x8x32xf32, #tpu.memory_space<vmem>>, %arg2: memref<2x1x8xi32, #tpu.memory_space<vmem>>, %arg3: memref<2x4x32xf32, #tpu.memory_space<vmem>>, %arg4: memref<224x64xf32, #tpu.memory_space<vmem>>, %arg5: memref<8x64xf32, #tpu.memory_space<vmem>>, %arg6: memref<2x8x32xf32, #tpu.memory_space<vmem>>) attributes {dimension_semantics = [#tpu.dimension_semantics<parallel>], iteration_bounds = array<i64: 1>, scalar_prefetch = 0 : i64, scratch_operands = 0 : i64, tpu.core_type = #tpu.core_type<tc>, window_params = [{transform_indices = @transform_0, window_bounds = array<i64: 2, 8, 32>}, {transform_indices = @transform_1, window_bounds = array<i64: 2, 1, 8>}, {transform_indices = @transform_2, window_bounds = array<i64: 2, 4, 32>}, {pipeline_mode = #tpu.pipeline_mode<synchronous>, transform_indices = @transform_3, window_bounds = array<i64: 224, 64>}, {pipeline_mode = #tpu.pipeline_mode<synchronous>, transform_indices = @transform_4, window_bounds = array<i64: 8, 64>}, {transform_indices = @transform_5, window_bounds = array<i64: 2, 8, 32>}]} {
    %c0 = arith.constant 0 : index
    %c0_0 = arith.constant 0 : index
    %0 = vector.load %arg4[%c0, %c0_0] : memref<224x64xf32, #tpu.memory_space<vmem>>, vector<96x32xf32>
    %c0_1 = arith.constant 0 : index
    %c32 = arith.constant 32 : index
    %1 = vector.load %arg4[%c0_1, %c32] : memref<224x64xf32, #tpu.memory_space<vmem>>, vector<96x1xf32>
    %c96 = arith.constant 96 : index
    %c0_2 = arith.constant 0 : index
    %2 = vector.load %arg4[%c96, %c0_2] : memref<224x64xf32, #tpu.memory_space<vmem>>, vector<32x32xf32>
    %c128 = arith.constant 128 : index
    %c0_3 = arith.constant 0 : index
    %3 = vector.load %arg4[%c128, %c0_3] : memref<224x64xf32, #tpu.memory_space<vmem>>, vector<32x64xf32>
    %c160 = arith.constant 160 : index
    %c0_4 = arith.constant 0 : index
    %4 = vector.load %arg4[%c160, %c0_4] : memref<224x64xf32, #tpu.memory_space<vmem>>, vector<64x32xf32>
    %c0_5 = arith.constant 0 : index
    %c0_6 = arith.constant 0 : index
    %5 = vector.load %arg5[%c0_5, %c0_6] : memref<8x64xf32, #tpu.memory_space<vmem>>, vector<1x32xf32>
    %c1 = arith.constant 1 : index
    %c0_7 = arith.constant 0 : index
    %6 = vector.load %arg5[%c1, %c0_7] : memref<8x64xf32, #tpu.memory_space<vmem>>, vector<1x64xf32>
    %c2 = arith.constant 2 : index
    %c0_8 = arith.constant 0 : index
    %7 = vector.load %arg5[%c2, %c0_8] : memref<8x64xf32, #tpu.memory_space<vmem>>, vector<1x32xf32>
    %c3 = arith.constant 3 : index
    %c0_9 = arith.constant 0 : index
    %8 = vector.load %arg5[%c3, %c0_9] : memref<8x64xf32, #tpu.memory_space<vmem>>, vector<1x32xf32>
    %c4 = arith.constant 4 : index
    %c0_10 = arith.constant 0 : index
    %9 = vector.load %arg5[%c4, %c0_10] : memref<8x64xf32, #tpu.memory_space<vmem>>, vector<1x32xf32>
    %c5 = arith.constant 5 : index
    %c0_11 = arith.constant 0 : index
    %10 = vector.load %arg5[%c5, %c0_11] : memref<8x64xf32, #tpu.memory_space<vmem>>, vector<1x32xf32>
    %c6 = arith.constant 6 : index
    %c0_12 = arith.constant 0 : index
    %11 = vector.load %arg5[%c6, %c0_12] : memref<8x64xf32, #tpu.memory_space<vmem>>, vector<1x32xf32>
    %c0_13 = arith.constant 0 : index
    %c0_14 = arith.constant 0 : index
    %c0_15 = arith.constant 0 : index
    %12 = vector.load %arg1[%c0_13, %c0_14, %c0_15] : memref<2x8x32xf32, #tpu.memory_space<vmem>>, vector<1x8x32xf32>
    %13 = vector.shape_cast %12 : vector<1x8x32xf32> to vector<8x32xf32>
    %c0_16 = arith.constant 0 : index
    %c0_17 = arith.constant 0 : index
    %c0_18 = arith.constant 0 : index
    %14 = vector.load %arg2[%c0_16, %c0_17, %c0_18] : memref<2x1x8xi32, #tpu.memory_space<vmem>>, vector<1x1x8xi32>
    %15 = vector.shape_cast %14 : vector<1x1x8xi32> to vector<1x8xi32>
    %c0_i32 = arith.constant 0 : i32
    %16 = vector.broadcast %c0_i32 : i32 to vector<1x8xi32>
    %17 = arith.cmpi sgt, %15, %16 : vector<1x8xi32>
    %c0_19 = arith.constant 0 : index
    %c0_20 = arith.constant 0 : index
    %c0_21 = arith.constant 0 : index
    %18 = vector.load %arg3[%c0_19, %c0_20, %c0_21] : memref<2x4x32xf32, #tpu.memory_space<vmem>>, vector<1x4x32xf32>
    %19 = vector.shape_cast %18 : vector<1x4x32xf32> to vector<4x32xf32>
    %cst = arith.constant dense<0.000000e+00> : vector<96x8xf32>
    %20 = tpu.matmul %0, %13, %cst {dimension_numbers = #tpu.dot_dimension_numbers<[1], [1], [0], [0], [0, 0, 1, 0], [], []>} : vector<96x32xf32>, vector<8x32xf32>, vector<96x8xf32> -> vector<96x8xf32>
    %21 = vector.broadcast %1 : vector<96x1xf32> to vector<96x8xf32>
    %22 = arith.addf %20, %21 : vector<96x8xf32>
    %23 = vector.extract_strided_slice %22 {offsets = [0, 0], sizes = [32, 8], strides = [1, 1]} : vector<96x8xf32> to vector<32x8xf32>
    %24 = vector.shape_cast %23 : vector<32x8xf32> to vector<4x8x8xf32>
    %25 = vector.extract_strided_slice %22 {offsets = [32, 0], sizes = [32, 8], strides = [1, 1]} : vector<96x8xf32> to vector<32x8xf32>
    %26 = vector.shape_cast %25 : vector<32x8xf32> to vector<4x8x8xf32>
    %27 = vector.extract_strided_slice %22 {offsets = [64, 0], sizes = [32, 8], strides = [1, 1]} : vector<96x8xf32> to vector<32x8xf32>
    %28 = vector.shape_cast %27 : vector<32x8xf32> to vector<4x8x8xf32>
    "tpu.trace_start"() <{level = 10 : i32, message = "hds,hdt->hst"}> : () -> ()
    %cst_22 = arith.constant dense<0.000000e+00> : vector<4x8x8xf32>
    %29 = tpu.matmul %24, %26, %cst_22 {dimension_numbers = #tpu.dot_dimension_numbers<[1], [1], [2], [2], [0, 0, 0, 2, 1, 2], [0], [0]>} : vector<4x8x8xf32>, vector<4x8x8xf32>, vector<4x8x8xf32> -> vector<4x8x8xf32>
    "tpu.trace_stop"() : () -> ()
    %cst_23 = arith.constant 0.353553385 : f32
    %30 = vector.broadcast %cst_23 : f32 to vector<4x8x8xf32>
    %31 = arith.mulf %29, %30 : vector<4x8x8xf32>
    %32 = vector.shape_cast %17 : vector<1x8xi1> to vector<1x1x8xi1>
    %cst_24 = arith.constant -1.000000e+09 : f32
    %33 = vector.shape_cast %32 : vector<1x1x8xi1> to vector<1x1x8xi1>
    %34 = vector.broadcast %33 : vector<1x1x8xi1> to vector<4x8x8xi1>
    %35 = vector.broadcast %cst_24 : f32 to vector<4x8x8xf32>
    %36 = arith.select %34, %35, %31 : vector<4x8x8xi1>, vector<4x8x8xf32>
    %cst_25 = arith.constant dense<0xFF800000> : vector<4x8xf32>
    %37 = vector.multi_reduction <maximumf>, %36, %cst_25 [2] : vector<4x8x8xf32> to vector<4x8xf32>
    %38 = vector.shape_cast %37 : vector<4x8xf32> to vector<4x8x1xf32>
    %39 = vector.broadcast %38 : vector<4x8x1xf32> to vector<4x8x8xf32>
    %40 = arith.subf %36, %39 : vector<4x8x8xf32>
    %41 = math.exp %40 : vector<4x8x8xf32>
    %cst_26 = arith.constant dense<0.000000e+00> : vector<4x8xf32>
    %42 = vector.multi_reduction <add>, %41, %cst_26 [2] : vector<4x8x8xf32> to vector<4x8xf32>
    %43 = vector.shape_cast %42 : vector<4x8xf32> to vector<4x8x1xf32>
    %44 = vector.broadcast %43 : vector<4x8x1xf32> to vector<4x8x8xf32>
    %45 = arith.divf %41, %44 : vector<4x8x8xf32>
    "tpu.trace_start"() <{level = 10 : i32, message = "hdt,hst->hds"}> : () -> ()
    %cst_27 = arith.constant dense<0.000000e+00> : vector<4x8x8xf32>
    %46 = tpu.matmul %28, %45, %cst_27 {dimension_numbers = #tpu.dot_dimension_numbers<[2], [2], [1], [1], [0, 0, 0, 1, 1, 1], [0], [0]>} : vector<4x8x8xf32>, vector<4x8x8xf32>, vector<4x8x8xf32> -> vector<4x8x8xf32>
    "tpu.trace_stop"() : () -> ()
    %47 = vector.shape_cast %46 : vector<4x8x8xf32> to vector<32x8xf32>
    %cst_28 = arith.constant dense<0.000000e+00> : vector<8x32xf32>
    %48 = tpu.matmul %47, %2, %cst_28 {dimension_numbers = #tpu.dot_dimension_numbers<[0], [0], [1], [1], [0, 1, 1, 1], [], []>} : vector<32x8xf32>, vector<32x32xf32>, vector<8x32xf32> -> vector<8x32xf32>
    %49 = vector.broadcast %5 : vector<1x32xf32> to vector<8x32xf32>
    %50 = arith.addf %48, %49 : vector<8x32xf32>
    %51 = arith.addf %13, %50 : vector<8x32xf32>
    %52 = vector.extract_strided_slice %19 {offsets = [0, 0], sizes = [1, 32], strides = [1, 1]} : vector<4x32xf32> to vector<1x32xf32>
    %53 = arith.addf %8, %52 : vector<1x32xf32>
    %54 = vector.extract_strided_slice %19 {offsets = [1, 0], sizes = [1, 32], strides = [1, 1]} : vector<4x32xf32> to vector<1x32xf32>
    %55 = arith.addf %9, %54 : vector<1x32xf32>
    %cst_29 = arith.constant dense<0.000000e+00> : vector<8xf32>
    %56 = vector.multi_reduction <add>, %51, %cst_29 [1] : vector<8x32xf32> to vector<8xf32>
    %57 = vector.shape_cast %56 : vector<8xf32> to vector<8x1xf32>
    %58 = arith.mulf %51, %51 : vector<8x32xf32>
    %cst_30 = arith.constant dense<0.000000e+00> : vector<8xf32>
    %59 = vector.multi_reduction <add>, %58, %cst_30 [1] : vector<8x32xf32> to vector<8xf32>
    %60 = vector.shape_cast %59 : vector<8xf32> to vector<8x1xf32>
    %cst_31 = arith.constant 3.125000e-02 : f32
    %61 = vector.broadcast %cst_31 : f32 to vector<8x1xf32>
    %62 = arith.mulf %57, %61 : vector<8x1xf32>
    %63 = arith.mulf %57, %62 : vector<8x1xf32>
    %64 = arith.subf %60, %63 : vector<8x1xf32>
    %cst_32 = arith.constant 0.0322580636 : f32
    %65 = vector.broadcast %cst_32 : f32 to vector<8x1xf32>
    %66 = arith.mulf %64, %65 : vector<8x1xf32>
    %cst_33 = arith.constant 0.000000e+00 : f32
    %67 = vector.broadcast %cst_33 : f32 to vector<8x1xf32>
    %68 = arith.maximumf %66, %67 : vector<8x1xf32>
    %69 = math.sqrt %68 : vector<8x1xf32>
    %70 = vector.broadcast %62 : vector<8x1xf32> to vector<8x32xf32>
    %71 = arith.subf %51, %70 : vector<8x32xf32>
    %72 = vector.broadcast %53 : vector<1x32xf32> to vector<8x32xf32>
    %73 = arith.mulf %72, %71 : vector<8x32xf32>
    %cst_34 = arith.constant 9.99999997E-7 : f32
    %74 = vector.broadcast %cst_34 : f32 to vector<8x1xf32>
    %75 = arith.addf %69, %74 : vector<8x1xf32>
    %76 = vector.broadcast %75 : vector<8x1xf32> to vector<8x32xf32>
    %77 = arith.divf %73, %76 : vector<8x32xf32>
    %78 = vector.broadcast %55 : vector<1x32xf32> to vector<8x32xf32>
    %79 = arith.addf %77, %78 : vector<8x32xf32>
    %cst_35 = arith.constant dense<0.000000e+00> : vector<8x64xf32>
    %80 = tpu.matmul %79, %3, %cst_35 {dimension_numbers = #tpu.dot_dimension_numbers<[1], [0], [0], [1], [0, 0, 1, 1], [], []>} : vector<8x32xf32>, vector<32x64xf32>, vector<8x64xf32> -> vector<8x64xf32>
    %81 = vector.broadcast %6 : vector<1x64xf32> to vector<8x64xf32>
    %82 = arith.addf %80, %81 : vector<8x64xf32>
    %cst_36 = arith.constant 0.000000e+00 : f32
    %83 = vector.broadcast %cst_36 : f32 to vector<8x64xf32>
    %84 = arith.maximumf %82, %83 : vector<8x64xf32>
    %cst_37 = arith.constant dense<0.000000e+00> : vector<8x32xf32>
    %85 = tpu.matmul %84, %4, %cst_37 {dimension_numbers = #tpu.dot_dimension_numbers<[1], [0], [0], [1], [0, 0, 1, 1], [], []>} : vector<8x64xf32>, vector<64x32xf32>, vector<8x32xf32> -> vector<8x32xf32>
    %86 = vector.broadcast %7 : vector<1x32xf32> to vector<8x32xf32>
    %87 = arith.addf %85, %86 : vector<8x32xf32>
    %88 = arith.addf %79, %87 : vector<8x32xf32>
    %89 = vector.extract_strided_slice %19 {offsets = [2, 0], sizes = [1, 32], strides = [1, 1]} : vector<4x32xf32> to vector<1x32xf32>
    %90 = arith.addf %10, %89 : vector<1x32xf32>
    %91 = vector.extract_strided_slice %19 {offsets = [3, 0], sizes = [1, 32], strides = [1, 1]} : vector<4x32xf32> to vector<1x32xf32>
    %92 = arith.addf %11, %91 : vector<1x32xf32>
    %cst_38 = arith.constant dense<0.000000e+00> : vector<8xf32>
    %93 = vector.multi_reduction <add>, %88, %cst_38 [1] : vector<8x32xf32> to vector<8xf32>
    %94 = vector.shape_cast %93 : vector<8xf32> to vector<8x1xf32>
    %95 = arith.mulf %88, %88 : vector<8x32xf32>
    %cst_39 = arith.constant dense<0.000000e+00> : vector<8xf32>
    %96 = vector.multi_reduction <add>, %95, %cst_39 [1] : vector<8x32xf32> to vector<8xf32>
    %97 = vector.shape_cast %96 : vector<8xf32> to vector<8x1xf32>
    %cst_40 = arith.constant 3.125000e-02 : f32
    %98 = vector.broadcast %cst_40 : f32 to vector<8x1xf32>
    %99 = arith.mulf %94, %98 : vector<8x1xf32>
    %100 = arith.mulf %94, %99 : vector<8x1xf32>
    %101 = arith.subf %97, %100 : vector<8x1xf32>
    %cst_41 = arith.constant 0.0322580636 : f32
    %102 = vector.broadcast %cst_41 : f32 to vector<8x1xf32>
    %103 = arith.mulf %101, %102 : vector<8x1xf32>
    %cst_42 = arith.constant 0.000000e+00 : f32
    %104 = vector.broadcast %cst_42 : f32 to vector<8x1xf32>
    %105 = arith.maximumf %103, %104 : vector<8x1xf32>
    %106 = math.sqrt %105 : vector<8x1xf32>
    %107 = vector.broadcast %99 : vector<8x1xf32> to vector<8x32xf32>
    %108 = arith.subf %88, %107 : vector<8x32xf32>
    %109 = vector.broadcast %90 : vector<1x32xf32> to vector<8x32xf32>
    %110 = arith.mulf %109, %108 : vector<8x32xf32>
    %cst_43 = arith.constant 9.99999997E-7 : f32
    %111 = vector.broadcast %cst_43 : f32 to vector<8x1xf32>
    %112 = arith.addf %106, %111 : vector<8x1xf32>
    %113 = vector.broadcast %112 : vector<8x1xf32> to vector<8x32xf32>
    %114 = arith.divf %110, %113 : vector<8x32xf32>
    %115 = vector.broadcast %92 : vector<1x32xf32> to vector<8x32xf32>
    %116 = arith.addf %114, %115 : vector<8x32xf32>
    %c0_44 = arith.constant 0 : index
    %c0_45 = arith.constant 0 : index
    %c0_46 = arith.constant 0 : index
    %117 = vector.load %arg6[%c0_44, %c0_45, %c0_46] : memref<2x8x32xf32, #tpu.memory_space<vmem>>, vector<1x8x32xf32>
    %118 = vector.shape_cast %117 : vector<1x8x32xf32> to vector<8x32xf32>
    %119 = vector.shape_cast %116 : vector<8x32xf32> to vector<1x8x32xf32>
    tpu.vector_store %arg6[%c0_44, %c0_45, %c0_46], %119 {strides = array<i32>} : memref<2x8x32xf32, #tpu.memory_space<vmem>>, vector<1x8x32xf32>,
    %c1_47 = arith.constant 1 : index
    %c0_48 = arith.constant 0 : index
    %c0_49 = arith.constant 0 : index
    %120 = vector.load %arg1[%c1_47, %c0_48, %c0_49] : memref<2x8x32xf32, #tpu.memory_space<vmem>>, vector<1x8x32xf32>
    %121 = vector.shape_cast %120 : vector<1x8x32xf32> to vector<8x32xf32>
    %c1_50 = arith.constant 1 : index
    %c0_51 = arith.constant 0 : index
    %c0_52 = arith.constant 0 : index
    %122 = vector.load %arg2[%c1_50, %c0_51, %c0_52] : memref<2x1x8xi32, #tpu.memory_space<vmem>>, vector<1x1x8xi32>
    %123 = vector.shape_cast %122 : vector<1x1x8xi32> to vector<1x8xi32>
    %c0_i32_53 = arith.constant 0 : i32
    %124 = vector.broadcast %c0_i32_53 : i32 to vector<1x8xi32>
    %125 = arith.cmpi sgt, %123, %124 : vector<1x8xi32>
    %c1_54 = arith.constant 1 : index
    %c0_55 = arith.constant 0 : index
    %c0_56 = arith.constant 0 : index
    %126 = vector.load %arg3[%c1_54, %c0_55, %c0_56] : memref<2x4x32xf32, #tpu.memory_space<vmem>>, vector<1x4x32xf32>
    %127 = vector.shape_cast %126 : vector<1x4x32xf32> to vector<4x32xf32>
    %cst_57 = arith.constant dense<0.000000e+00> : vector<96x8xf32>
    %128 = tpu.matmul %0, %121, %cst_57 {dimension_numbers = #tpu.dot_dimension_numbers<[1], [1], [0], [0], [0, 0, 1, 0], [], []>} : vector<96x32xf32>, vector<8x32xf32>, vector<96x8xf32> -> vector<96x8xf32>
    %129 = vector.broadcast %1 : vector<96x1xf32> to vector<96x8xf32>
    %130 = arith.addf %128, %129 : vector<96x8xf32>
    %131 = vector.extract_strided_slice %130 {offsets = [0, 0], sizes = [32, 8], strides = [1, 1]} : vector<96x8xf32> to vector<32x8xf32>
    %132 = vector.shape_cast %131 : vector<32x8xf32> to vector<4x8x8xf32>
    %133 = vector.extract_strided_slice %130 {offsets = [32, 0], sizes = [32, 8], strides = [1, 1]} : vector<96x8xf32> to vector<32x8xf32>
    %134 = vector.shape_cast %133 : vector<32x8xf32> to vector<4x8x8xf32>
    %135 = vector.extract_strided_slice %130 {offsets = [64, 0], sizes = [32, 8], strides = [1, 1]} : vector<96x8xf32> to vector<32x8xf32>
    %136 = vector.shape_cast %135 : vector<32x8xf32> to vector<4x8x8xf32>
    "tpu.trace_start"() <{level = 10 : i32, message = "hds,hdt->hst"}> : () -> ()
    %cst_58 = arith.constant dense<0.000000e+00> : vector<4x8x8xf32>
    %137 = tpu.matmul %132, %134, %cst_58 {dimension_numbers = #tpu.dot_dimension_numbers<[1], [1], [2], [2], [0, 0, 0, 2, 1, 2], [0], [0]>} : vector<4x8x8xf32>, vector<4x8x8xf32>, vector<4x8x8xf32> -> vector<4x8x8xf32>
    "tpu.trace_stop"() : () -> ()
    %cst_59 = arith.constant 0.353553385 : f32
    %138 = vector.broadcast %cst_59 : f32 to vector<4x8x8xf32>
    %139 = arith.mulf %137, %138 : vector<4x8x8xf32>
    %140 = vector.shape_cast %125 : vector<1x8xi1> to vector<1x1x8xi1>
    %cst_60 = arith.constant -1.000000e+09 : f32
    %141 = vector.shape_cast %140 : vector<1x1x8xi1> to vector<1x1x8xi1>
    %142 = vector.broadcast %141 : vector<1x1x8xi1> to vector<4x8x8xi1>
    %143 = vector.broadcast %cst_60 : f32 to vector<4x8x8xf32>
    %144 = arith.select %142, %143, %139 : vector<4x8x8xi1>, vector<4x8x8xf32>
    %cst_61 = arith.constant dense<0xFF800000> : vector<4x8xf32>
    %145 = vector.multi_reduction <maximumf>, %144, %cst_61 [2] : vector<4x8x8xf32> to vector<4x8xf32>
    %146 = vector.shape_cast %145 : vector<4x8xf32> to vector<4x8x1xf32>
    %147 = vector.broadcast %146 : vector<4x8x1xf32> to vector<4x8x8xf32>
    %148 = arith.subf %144, %147 : vector<4x8x8xf32>
    %149 = math.exp %148 : vector<4x8x8xf32>
    %cst_62 = arith.constant dense<0.000000e+00> : vector<4x8xf32>
    %150 = vector.multi_reduction <add>, %149, %cst_62 [2] : vector<4x8x8xf32> to vector<4x8xf32>
    %151 = vector.shape_cast %150 : vector<4x8xf32> to vector<4x8x1xf32>
    %152 = vector.broadcast %151 : vector<4x8x1xf32> to vector<4x8x8xf32>
    %153 = arith.divf %149, %152 : vector<4x8x8xf32>
    "tpu.trace_start"() <{level = 10 : i32, message = "hdt,hst->hds"}> : () -> ()
    %cst_63 = arith.constant dense<0.000000e+00> : vector<4x8x8xf32>
    %154 = tpu.matmul %136, %153, %cst_63 {dimension_numbers = #tpu.dot_dimension_numbers<[2], [2], [1], [1], [0, 0, 0, 1, 1, 1], [0], [0]>} : vector<4x8x8xf32>, vector<4x8x8xf32>, vector<4x8x8xf32> -> vector<4x8x8xf32>
    "tpu.trace_stop"() : () -> ()
    %155 = vector.shape_cast %154 : vector<4x8x8xf32> to vector<32x8xf32>
    %cst_64 = arith.constant dense<0.000000e+00> : vector<8x32xf32>
    %156 = tpu.matmul %155, %2, %cst_64 {dimension_numbers = #tpu.dot_dimension_numbers<[0], [0], [1], [1], [0, 1, 1, 1], [], []>} : vector<32x8xf32>, vector<32x32xf32>, vector<8x32xf32> -> vector<8x32xf32>
    %157 = vector.broadcast %5 : vector<1x32xf32> to vector<8x32xf32>
    %158 = arith.addf %156, %157 : vector<8x32xf32>
    %159 = arith.addf %121, %158 : vector<8x32xf32>
    %160 = vector.extract_strided_slice %127 {offsets = [0, 0], sizes = [1, 32], strides = [1, 1]} : vector<4x32xf32> to vector<1x32xf32>
    %161 = arith.addf %8, %160 : vector<1x32xf32>
    %162 = vector.extract_strided_slice %127 {offsets = [1, 0], sizes = [1, 32], strides = [1, 1]} : vector<4x32xf32> to vector<1x32xf32>
    %163 = arith.addf %9, %162 : vector<1x32xf32>
    %cst_65 = arith.constant dense<0.000000e+00> : vector<8xf32>
    %164 = vector.multi_reduction <add>, %159, %cst_65 [1] : vector<8x32xf32> to vector<8xf32>
    %165 = vector.shape_cast %164 : vector<8xf32> to vector<8x1xf32>
    %166 = arith.mulf %159, %159 : vector<8x32xf32>
    %cst_66 = arith.constant dense<0.000000e+00> : vector<8xf32>
    %167 = vector.multi_reduction <add>, %166, %cst_66 [1] : vector<8x32xf32> to vector<8xf32>
    %168 = vector.shape_cast %167 : vector<8xf32> to vector<8x1xf32>
    %cst_67 = arith.constant 3.125000e-02 : f32
    %169 = vector.broadcast %cst_67 : f32 to vector<8x1xf32>
    %170 = arith.mulf %165, %169 : vector<8x1xf32>
    %171 = arith.mulf %165, %170 : vector<8x1xf32>
    %172 = arith.subf %168, %171 : vector<8x1xf32>
    %cst_68 = arith.constant 0.0322580636 : f32
    %173 = vector.broadcast %cst_68 : f32 to vector<8x1xf32>
    %174 = arith.mulf %172, %173 : vector<8x1xf32>
    %cst_69 = arith.constant 0.000000e+00 : f32
    %175 = vector.broadcast %cst_69 : f32 to vector<8x1xf32>
    %176 = arith.maximumf %174, %175 : vector<8x1xf32>
    %177 = math.sqrt %176 : vector<8x1xf32>
    %178 = vector.broadcast %170 : vector<8x1xf32> to vector<8x32xf32>
    %179 = arith.subf %159, %178 : vector<8x32xf32>
    %180 = vector.broadcast %161 : vector<1x32xf32> to vector<8x32xf32>
    %181 = arith.mulf %180, %179 : vector<8x32xf32>
    %cst_70 = arith.constant 9.99999997E-7 : f32
    %182 = vector.broadcast %cst_70 : f32 to vector<8x1xf32>
    %183 = arith.addf %177, %182 : vector<8x1xf32>
    %184 = vector.broadcast %183 : vector<8x1xf32> to vector<8x32xf32>
    %185 = arith.divf %181, %184 : vector<8x32xf32>
    %186 = vector.broadcast %163 : vector<1x32xf32> to vector<8x32xf32>
    %187 = arith.addf %185, %186 : vector<8x32xf32>
    %cst_71 = arith.constant dense<0.000000e+00> : vector<8x64xf32>
    %188 = tpu.matmul %187, %3, %cst_71 {dimension_numbers = #tpu.dot_dimension_numbers<[1], [0], [0], [1], [0, 0, 1, 1], [], []>} : vector<8x32xf32>, vector<32x64xf32>, vector<8x64xf32> -> vector<8x64xf32>
    %189 = vector.broadcast %6 : vector<1x64xf32> to vector<8x64xf32>
    %190 = arith.addf %188, %189 : vector<8x64xf32>
    %cst_72 = arith.constant 0.000000e+00 : f32
    %191 = vector.broadcast %cst_72 : f32 to vector<8x64xf32>
    %192 = arith.maximumf %190, %191 : vector<8x64xf32>
    %cst_73 = arith.constant dense<0.000000e+00> : vector<8x32xf32>
    %193 = tpu.matmul %192, %4, %cst_73 {dimension_numbers = #tpu.dot_dimension_numbers<[1], [0], [0], [1], [0, 0, 1, 1], [], []>} : vector<8x64xf32>, vector<64x32xf32>, vector<8x32xf32> -> vector<8x32xf32>
    %194 = vector.broadcast %7 : vector<1x32xf32> to vector<8x32xf32>
    %195 = arith.addf %193, %194 : vector<8x32xf32>
    %196 = arith.addf %187, %195 : vector<8x32xf32>
    %197 = vector.extract_strided_slice %127 {offsets = [2, 0], sizes = [1, 32], strides = [1, 1]} : vector<4x32xf32> to vector<1x32xf32>
    %198 = arith.addf %10, %197 : vector<1x32xf32>
    %199 = vector.extract_strided_slice %127 {offsets = [3, 0], sizes = [1, 32], strides = [1, 1]} : vector<4x32xf32> to vector<1x32xf32>
    %200 = arith.addf %11, %199 : vector<1x32xf32>
    %cst_74 = arith.constant dense<0.000000e+00> : vector<8xf32>
    %201 = vector.multi_reduction <add>, %196, %cst_74 [1] : vector<8x32xf32> to vector<8xf32>
    %202 = vector.shape_cast %201 : vector<8xf32> to vector<8x1xf32>
    %203 = arith.mulf %196, %196 : vector<8x32xf32>
    %cst_75 = arith.constant dense<0.000000e+00> : vector<8xf32>
    %204 = vector.multi_reduction <add>, %203, %cst_75 [1] : vector<8x32xf32> to vector<8xf32>
    %205 = vector.shape_cast %204 : vector<8xf32> to vector<8x1xf32>
    %cst_76 = arith.constant 3.125000e-02 : f32
    %206 = vector.broadcast %cst_76 : f32 to vector<8x1xf32>
    %207 = arith.mulf %202, %206 : vector<8x1xf32>
    %208 = arith.mulf %202, %207 : vector<8x1xf32>
    %209 = arith.subf %205, %208 : vector<8x1xf32>
    %cst_77 = arith.constant 0.0322580636 : f32
    %210 = vector.broadcast %cst_77 : f32 to vector<8x1xf32>
    %211 = arith.mulf %209, %210 : vector<8x1xf32>
    %cst_78 = arith.constant 0.000000e+00 : f32
    %212 = vector.broadcast %cst_78 : f32 to vector<8x1xf32>
    %213 = arith.maximumf %211, %212 : vector<8x1xf32>
    %214 = math.sqrt %213 : vector<8x1xf32>
    %215 = vector.broadcast %207 : vector<8x1xf32> to vector<8x32xf32>
    %216 = arith.subf %196, %215 : vector<8x32xf32>
    %217 = vector.broadcast %198 : vector<1x32xf32> to vector<8x32xf32>
    %218 = arith.mulf %217, %216 : vector<8x32xf32>
    %cst_79 = arith.constant 9.99999997E-7 : f32
    %219 = vector.broadcast %cst_79 : f32 to vector<8x1xf32>
    %220 = arith.addf %214, %219 : vector<8x1xf32>
    %221 = vector.broadcast %220 : vector<8x1xf32> to vector<8x32xf32>
    %222 = arith.divf %218, %221 : vector<8x32xf32>
    %223 = vector.broadcast %200 : vector<1x32xf32> to vector<8x32xf32>
    %224 = arith.addf %222, %223 : vector<8x32xf32>
    %c1_80 = arith.constant 1 : index
    %c0_81 = arith.constant 0 : index
    %c0_82 = arith.constant 0 : index
    %225 = vector.load %arg6[%c1_80, %c0_81, %c0_82] : memref<2x8x32xf32, #tpu.memory_space<vmem>>, vector<1x8x32xf32>
    %226 = vector.shape_cast %225 : vector<1x8x32xf32> to vector<8x32xf32>
    %227 = vector.shape_cast %224 : vector<8x32xf32> to vector<1x8x32xf32>
    tpu.vector_store %arg6[%c1_80, %c0_81, %c0_82], %227 {strides = array<i32>} : memref<2x8x32xf32, #tpu.memory_space<vmem>>, vector<1x8x32xf32>,
    return
  }
  func.func @transform_0(%arg0: i32) -> (i32, i32, i32) {
    %c0_i32 = arith.constant 0 : i32
    %c0_i32_0 = arith.constant 0 : i32
    %c0_i32_1 = arith.constant 0 : i32
    return %arg0, %c0_i32, %c0_i32_0 : i32, i32, i32
  }
  func.func @transform_1(%arg0: i32) -> (i32, i32, i32) {
    %c0_i32 = arith.constant 0 : i32
    %c0_i32_0 = arith.constant 0 : i32
    %c0_i32_1 = arith.constant 0 : i32
    return %arg0, %c0_i32, %c0_i32_0 : i32, i32, i32
  }
  func.func @transform_2(%arg0: i32) -> (i32, i32, i32) {
    %c0_i32 = arith.constant 0 : i32
    %c0_i32_0 = arith.constant 0 : i32
    %c0_i32_1 = arith.constant 0 : i32
    return %arg0, %c0_i32, %c0_i32_0 : i32, i32, i32
  }
  func.func @transform_3(%arg0: i32) -> (i32, i32) {
    %c0_i32 = arith.constant 0 : i32
    %c0_i32_0 = arith.constant 0 : i32
    %c0_i32_1 = arith.constant 0 : i32
    return %c0_i32, %c0_i32_0 : i32, i32
  }
  func.func @transform_4(%arg0: i32) -> (i32, i32) {
    %c0_i32 = arith.constant 0 : i32
    %c0_i32_0 = arith.constant 0 : i32
    %c0_i32_1 = arith.constant 0 : i32
    return %c0_i32, %c0_i32_0 : i32, i32
  }
  func.func @transform_5(%arg0: i32) -> (i32, i32, i32) {
    %c0_i32 = arith.constant 0 : i32
    %c0_i32_0 = arith.constant 0 : i32
    %c0_i32_1 = arith.constant 0 : i32
    return %arg0, %c0_i32, %c0_i32_0 : i32, i32, i32
  }
}

</mosaic_0001>

<bundles_post_ra>
// kernel: sag_forward.1
= control target key start
LH: loop header
LB: loop body
LE: loop exit
PB: predicated region body
PF: predicated region fallthrough
CT: control target
= control target key end

     0   :  { %vm120_vm0 = vcmask 261120   ;;  %v1708_v2 = vmov 32   ;;  %s2254_s0 = inlined_call_operand.vmem [shape: f32[2,8,32], index: 0, kind: input, shape index: {}]   ;;  %s2255_s1 = inlined_call_operand.vmem [shape: s32[2,1,8], index: 1, kind: input, shape index: {}]   ;;  %s2256_s2 = inlined_call_operand.vmem [shape: f32[2,4,32], index: 2, kind: input, shape index: {}]   ;;  %s2257_s3 = inlined_call_operand.vmem [shape: f32[224,64], index: 3, kind: input, shape index: {}]   ;;  %s2258_s4 = inlined_call_operand.vmem [shape: f32[8,64], index: 4, kind: input, shape index: {}]   ;;  %s2259_s5 = inlined_call_operand.hbm [shape: f32[2,8,32], index: 5, kind: output, shape index: {}]  }
   0x1   :  { %v1746_v0 = vld [vmem:[%s2254_s0] sm:$0xff]  ;;  %1628 = vset.pattern.permute.xlu0 %v1708_v2  ;;  %1629 = vset.pattern.permute.xlu1 %v1708_v2  ;;  %v1764_v4 = vld [vmem:[%s2257_s3 + $0x18] sm:$0xff] }
   0x2   :  { %v1751_v1 = vld [vmem:[%s2257_s3] sm:$0xff]  ;;  %1562 = vmatpush.xpose.msk.msra.mxu0 %vm120_vm0, %v1746_v0  ;;  %1630 = vset.pattern.permute.xlu2 %v1708_v2 }
   0x3   :  { %v1758_v3 = vld [vmem:[%s2257_s3 + $0x20] sm:$0xff]  ;;  %62 = vperm.xlu0 %1628, %v1751_v1  }
   0x4   :  { %82 = vperm.xlu1 %1629, %v1758_v3  }
   0x5   :  { %10 = vsyncpa [#allocation3], 0  ;;  %1563 = vmatmul.msk.f32.vlgmr.msra.gmra.mxu0 %vm120_vm0, %v1751_v1  ;;  %77 = vperm.xlu2 %1630, %v1764_v4   ;;  %v1773_v5 = vld [vmem:[%s2257_s3 + $0x8] sm:$0xff]  ;;  %v1778_v6 = vld [vmem:[%s2257_s3 + $0x10] sm:$0xff]  ;;  %vm233_vm1 = vcmask 64512   ;;  %v1709_v39 = vmov 0  }
   0x6   :  { %v1785_v7 = vld [vmem:[%s2257_s3 + $0x28] sm:$0xff]  ;;  %v1793_v8 = vld [vmem:[%s2257_s3 + $0x30] sm:$0xff]  ;;  %v1798_v9 = vld [vmem:[%s2257_s3 + $0x38] sm:$0xff]  ;;  %s1550_s23 = sshll.u32 %s2259_s5, 4  ;;  %s1711_s24 = smov 128   ;;  %s1551_s23 = int_to_ptr.hbm [resolvable:$true] %s1550_s23 }
   0x7   :  { %v57_v38 = vld [vmem:[%s2255_s1] sm:$0x1]  ;;  %v1863_v48 = vld [vmem:[%s2257_s3 + $0x48] sm:$0xff]  ;;  %v1880_v62 = vld [vmem:[%s2257_s3 + $0x50] sm:$0xff]  ;;  %s1712_s25 = smov 8  }
   0x8   :  { %vm58_vm2 = vcmp.gt.s32.totalorder %v57_v38, 0  ;;  %v1853_v44 = vld [vmem:[%s2257_s3 + $0x40] sm:$0xff] }
   0x9   :  { %v426_v40 = vsel %vm58_vm2, 1, %v1709_v39 }
   0xa   :  { %v427_v41 = vperm.slane %v426_v40, 0 }
   0xb   :  { %67 = vperm.xlu0 %1628, %v1773_v5  }
   0xc   :  { %72 = vperm.xlu1 %1629, %v1778_v6   ;;  %vm1846_vm3 = vcmp.eq.s32.totalorder %v427_v41, 1 }
   0xd   :  { %1564 = vmatmul.msk.f32.gmra.mxu0 %vm120_vm0, %v1773_v5  ;;  %87 = vperm.xlu2 %1630, %v1785_v7  }
  0x13   :  { %92 = vperm.xlu0 %1628, %v1793_v8  }
  0x14   :  { %97 = vperm.xlu1 %1629, %v1798_v9  }
  0x15   :  { %1565 = vmatmul.msk.f32.gmra.mxu0 %vm120_vm0, %v1778_v6 }
  0x1d   :  { %1566 = vmatmul.msk.f32.gmra.mxu0 %vm120_vm0, %v1764_v4 }
  0x25   :  { %1567 = vmatmul.msk.f32.gmra.mxu0 %vm120_vm0, %v1758_v3 }
  0x2d   :  { %1568 = vmatmul.msk.f32.gmra.mxu0 %vm120_vm0, %v1785_v7 }
  0x35   :  { %1569 = vmatmul.msk.f32.gmra.mxu0 %vm120_vm0, %v1793_v8 }
  0x3d   :  { %1570 = vmatmul.msk.f32.gmra.mxu0 %vm120_vm0, %v1798_v9 }
  0x45   :  { %1571 = vmatmul.msk.f32.gmra.mxu0 %vm120_vm0, %v1853_v44 }
  0x4d   :  { %1572 = vmatmul.msk.f32.gmra.mxu0 %vm120_vm0, %v1863_v48 }
  0x55   :  { %1573 = vmatmul.msk.f32.gmra.mxu0 %vm120_vm0, %v1880_v62 }
  0x5f   :  { %v1825_v20 = vpop.permute.xlu2 %77 }
  0x67   :  { %v1829_v25 = vpop.permute.xlu2 %87 }
  0x75   :  { %v1814_v10 = vpop.permute.xlu0 %62 }
  0x76   :  { %v1817_v13 = vpop.permute.xlu1 %82 }
  0x7d   :  { %v1819_v14 = vpop.permute.xlu0 %67 }
  0x7e   :  { %v1822_v17 = vpop.permute.xlu1 %72 }
  0x82   :  { %v165_v11 = vpop.f32.mrf.mxu0 }
  0x83   :  { %v166_v12 = vadd.f32 %v165_v11, %v1814_v10 }
  0x85   :  { %201 = vxpose.xlu2.b32.start.end [1/1] (short) (narrow) %v166_v12, 8  ;;  %v1832_v28 = vpop.permute.xlu0 %92 }
  0x86   :  { %v1835_v31 = vpop.permute.xlu1 %97 }
  0x8a   :  { %v168_v15 = vpop.f32.mrf.mxu0 }
  0x8b   :  { %v169_v16 = vadd.f32 %v168_v15, %v1819_v14 }
  0x8d   :  { %257 = vxpose.xlu0.b32.start.end [1/1] (short) (narrow) %v169_v16, 8 }
  0x92   :  { %v171_v18 = vpop.f32.mrf.mxu0 }
  0x93   :  { %v172_v19 = vadd.f32 %v171_v18, %v1822_v17 }
  0x95   :  { %312 = vxpose.xlu1.b32.start.end [1/1] (short) (narrow) %v172_v19, 8  ;;  %v1888_v19 = vld [vmem:[%s2257_s3 + $0x58] sm:$0xff] }
  0x96   :  { %1574 = vmatmul.msk.f32.gmra.mxu0 %vm120_vm0, %v1888_v19 }
  0x9a   :  { %v174_v21 = vpop.f32.mrf.mxu0 }
  0x9b   :  { %v175_v22 = vadd.f32 %v174_v21, %v1825_v20 }
  0x9d   :  { %367 = vxpose.xlu2.b32.start.end [1/1] (short) (narrow) %v175_v22, 8 }
  0xa2   :  { %v177_v23 = vpop.f32.mrf.mxu0 }
  0xa3   :  { %v178_v24 = vadd.f32 %v177_v23, %v1817_v13 }
  0xa5   :  { %252 = vmatpush.msra.mxu2 %v178_v24 }
  0xaa   :  { %v180_v26 = vpop.f32.mrf.mxu0 }
  0xab   :  { %v181_v27 = vadd.f32 %v180_v26, %v1829_v25 }
  0xad   :  { %307 = vmatpush.msrb.mxu2 %v181_v27 }
  0xb2   :  { %v183_v29 = vpop.f32.mrf.mxu0 }
  0xb3   :  { %v184_v30 = vadd.f32 %v183_v29, %v1832_v28 }
  0xb5   :  { %362 = vmatpush.msra.mxu3 %v184_v30 }
  0xba   :  { %v186_v32 = vpop.f32.mrf.mxu0 }
  0xbb   :  { %v187_v33 = vadd.f32 %v186_v32, %v1835_v31 }
  0xbd   :  { %417 = vmatpush.msra.mxu1 %v187_v33 }
 0x11e   :  { %v217_v34 = vpop.trf.xlu2 }
 0x11f   :  { %1575 = vmatmul.msk.f32.vlgmr.msra.gmra.mxu2 %vm233_vm1, %v217_v34 }
 0x131   :  { %v273_v35 = vpop.trf.xlu0 }
 0x132   :  { %1576 = vmatmul.msk.f32.vlgmr.msrb.gmra.mxu2 %vm233_vm1, %v273_v35 }
 0x136   :  { %v383_v36 = vpop.trf.xlu2 }
 0x137   :  { %1578 = vmatmul.msk.f32.vlgmr.msra.gmra.mxu1 %vm233_vm1, %v383_v36 }
 0x139   :  { %v328_v37 = vpop.trf.xlu1 }
 0x13a   :  { %1577 = vmatmul.msk.f32.vlgmr.msra.gmra.mxu3 %vm233_vm1, %v328_v37 }
 0x1a2   :  { %v254_v42 = vpop.f32.mrf.mxu2 }
 0x1a3   :  { %v422_v45 = vmul.f32 0.35355338, %v254_v42 }
 0x1a5   :  { %v429_v46 = vsel %vm1846_vm3, -1e+09, %v422_v45 }
 0x1a6   :  { %v433_v47 = vsel %vm233_vm1, %v429_v46, -inf }
 0x1a7   :  { %434 = vmax.xlane.f32.xlu0 %v433_v47 }
 0x1b4   :  { %v419_v49 = vpop.f32.mrf.mxu1 }
 0x1b5   :  { %v425_v50 = vmul.f32 0.35355338, %v419_v49  ;;  %v309_v51 = vpop.f32.mrf.mxu2 }
 0x1b6   :  { %v423_v52 = vmul.f32 0.35355338, %v309_v51 }
 0x1b7   :  { %v432_v53 = vsel %vm1846_vm3, -1e+09, %v425_v50 }
 0x1b8   :  { %v442_v54 = vsel %vm233_vm1, %v432_v53, -inf  ;;  %v430_v55 = vsel %vm1846_vm3, -1e+09, %v423_v52 }
 0x1b9   :  { %443 = vmax.xlane.f32.xlu1 %v442_v54  ;;  %v436_v56 = vsel %vm233_vm1, %v430_v55, -inf  ;;  %v189_v54 = vpop.f32.mrf.mxu0 }
 0x1ba   :  { %437 = vmax.xlane.f32.xlu2 %v436_v56 }
 0x1bd   :  { %v364_v57 = vpop.f32.mrf.mxu3 }
 0x1be   :  { %v424_v58 = vmul.f32 0.35355338, %v364_v57 }
 0x1c0   :  { %v431_v59 = vsel %vm1846_vm3, -1e+09, %v424_v58 }
 0x1c1   :  { %v439_v60 = vsel %vm233_vm1, %v431_v59, -inf }
 0x1c2   :  { %440 = vmax.xlane.f32.xlu0 %v439_v60 }
 0x1d6   :  { %107 = vperm.xlu0 %1628, %v1863_v48  }
 0x21a   :  { %v435_v61 = vpop.xlane.xlu0 %434 }
 0x21b   :  { %v445_v63 = vsub.f32 %v429_v46, %v435_v61 }
 0x21d   :  { %v449_v2 = vmul.f32 1.442695, %v445_v63 }
 0x21f   :  { %1634 = vpow2.f32 %v449_v2 }
 0x225   :  { %v1635_v11 = vpop.eup %1634 }
 0x226   :  { %v457_v12 = vsel %vm233_vm1, %v1635_v11, 0.0 }
 0x227   :  { %458 = vadd.xlane.f32.xlu1 %v457_v12 }
 0x22c   :  { %v444_v15 = vpop.xlane.xlu1 %443 }
 0x22d   :  { %v448_v16 = vsub.f32 %v432_v53, %v444_v15  ;;  %v438_v18 = vpop.xlane.xlu2 %437 }
 0x22e   :  { %v446_v21 = vsub.f32 %v430_v55, %v438_v18 }
 0x22f   :  { %v455_v22 = vmul.f32 1.442695, %v448_v16 }
 0x230   :  { %v451_v23 = vmul.f32 1.442695, %v446_v21 }
 0x231   :  { %1636 = vpow2.f32 %v455_v22 }
 0x232   :  { %1638 = vpow2.f32 %v451_v23  ;;  %v192_v23 = vpop.f32.mrf.mxu0 }
 0x235   :  { %v441_v24 = vpop.xlane.xlu0 %440 }
 0x236   :  { %v447_v26 = vsub.f32 %v431_v59, %v441_v24 }
 0x237   :  { %v1892_v27 = vpop.eup %1636 }
 0x238   :  { %v1894_v29 = vpop.eup %1638  ;;  %v453_v30 = vmul.f32 1.442695, %v447_v26  ;;  %v466_v32 = vsel %vm233_vm1, %v1892_v27, 0.0 }
 0x239   :  { %467 = vadd.xlane.f32.xlu0 %v466_v32  ;;  %v460_v33 = vsel %vm233_vm1, %v1894_v29, 0.0 }
 0x23a   :  { %1640 = vpow2.f32 %v453_v30  ;;  %461 = vadd.xlane.f32.xlu2 %v460_v33 }
 0x240   :  { %v1900_v34 = vpop.eup %1640 }
 0x241   :  { %v463_v35 = vsel %vm233_vm1, %v1900_v34, 0.0 }
 0x242   :  { %464 = vadd.xlane.f32.xlu1 %v463_v35 }
 0x248   :  { %v1907_v40 = vpop.permute.xlu0 %107 }
 0x24d   :  { %112 = vperm.xlu0 %1628, %v1880_v62  }
 0x252   :  { %102 = vperm.xlu2 %1630, %v1853_v44  }
 0x25b   :  { %117 = vperm.xlu1 %1629, %v1888_v19  }
 0x29a   :  { %v459_v36 = vpop.xlane.xlu1 %458 }
 0x29b   :  { %1642 = vrcp.f32 %v459_v36  ;;  %v480_v42 = vand.u32 2147483648, %v459_v36  ;;  %v478_v45 = vand.u32 2147483647, %v459_v36  ;;  %vm474_vm5 = vweird.f32 %v459_v36 }
 0x29d   :  { %v481_v47 = vor.u32 1.1754944e-38, %v480_v42  ;;  %vm479_vm7 = vcmp.eq.f32.partialorder %v478_v45, 8.507059e+37 }
 0x2a1   :  { %v1643_v37 = vpop.eup %1642 }
 0x2a2   :  { %v470_v38 = vmul.f32 %v1643_v37, %v459_v36  ;;  %vm475_vm4 = vweird.f32 %v1643_v37 }
 0x2a3   :  { %vm476_vm6 = vmor %vm474_vm5, %vm475_vm4 }
 0x2a4   :  { %v471_v41 = vsub.f32 1.0, %v470_v38 }
 0x2a6   :  { %v472_v43 = vmul.f32 %v1643_v37, %v471_v41 }
 0x2a8   :  { %v473_v46 = vadd.f32 %v1643_v37, %v472_v43 }
 0x2aa   :  { %v477_v49 = vsel %vm476_vm6, %v1643_v37, %v473_v46 }
 0x2ab   :  { %v482_v50 = vsel %vm479_vm7, %v481_v47, %v477_v49  ;;  %v193_v49 = vadd.f32 %v192_v23, %v1907_v40 }
 0x2ac   :  { %v468_v51 = vpop.xlane.xlu0 %467  ;;  %v483_v52 = vmul.f32 %v1635_v11, %v482_v50  ;;  %v195_v50 = vpop.f32.mrf.mxu0 }
 0x2ad   :  { %1644 = vrcp.f32 %v468_v51  ;;  %v462_v53 = vpop.xlane.xlu2 %461  ;;  %v525_v63 = vand.u32 2147483648, %v468_v51  ;;  %v523_v15 = vand.u32 2147483647, %v468_v51  ;;  %vm519_vm10 = vweird.f32 %v468_v51 }
 0x2ae   :  { %1646 = vrcp.f32 %v462_v53  ;;  %1579 = vmatpush.xpose.msk.msra.mxu2 %vm233_vm1, %v483_v52  ;;  %v495_v16 = vand.u32 2147483648, %v462_v53  ;;  %v493_v21 = vand.u32 2147483647, %v462_v53  ;;  %vm489_vm12 = vweird.f32 %v462_v53 }
 0x2af   :  { %v526_v24 = vor.u32 1.1754944e-38, %v525_v63  ;;  %vm524_vm13 = vcmp.eq.f32.partialorder %v523_v15, 8.507059e+37 }
 0x2b0   :  { %v496_v33 = vor.u32 1.1754944e-38, %v495_v16  ;;  %vm494_vm15 = vcmp.eq.f32.partialorder %v493_v21, 8.507059e+37  ;;  %v1957_v16 = vld [vmem:[%s2254_s0 + $0x8] sm:$0xff] }
 0x2b3   :  { %v1645_v55 = vpop.eup %1644 }
 0x2b4   :  { %v1647_v56 = vpop.eup %1646  ;;  %v515_v57 = vmul.f32 %v1645_v55, %v468_v51  ;;  %vm520_vm8 = vweird.f32 %v1645_v55 }
 0x2b5   :  { %v485_v58 = vmul.f32 %v1647_v56, %v462_v53  ;;  %v465_v59 = vpop.xlane.xlu1 %464  ;;  %v1910_v60 = vpop.permute.xlu2 %102  ;;  %vm490_vm9 = vweird.f32 %v1647_v56  ;;  %vm521_vm11 = vmor %vm519_vm10, %vm520_vm8 }
 0x2b6   :  { %v516_v61 = vsub.f32 1.0, %v515_v57  ;;  %1648 = vrcp.f32 %v465_v59  ;;  %v190_v12 = vadd.f32 %v189_v54, %v1910_v60  ;;  %vm491_vm14 = vmor %vm489_vm12, %vm490_vm9  ;;  %v510_v45 = vand.u32 2147483648, %v465_v59 }
 0x2b7   :  { %v486_v2 = vsub.f32 1.0, %v485_v58  ;;  %v508_v47 = vand.u32 2147483647, %v465_v59  ;;  %vm504_vm3 = vweird.f32 %v465_v59  ;;  %vm766_vm12 = vcmask 523264  }
 0x2b8   :  { %v517_v11 = vmul.f32 %v1645_v55, %v516_v61  ;;  %1580 = vmatmul.msk.f32.vlgmr.msra.gmra.mxu2 %vm233_vm1, %v190_v12  ;;  %v511_v52 = vor.u32 1.1754944e-38, %v510_v45  ;;  %v1944_v61 = vld [vmem:[%s2257_s3 + $0x68] sm:$0xff] }
 0x2b9   :  { %v487_v18 = vmul.f32 %v1647_v56, %v486_v2  ;;  %vm509_vm5 = vcmp.eq.f32.partialorder %v508_v47, 8.507059e+37  ;;  %v1950_v2 = vld [vmem:[%s2257_s3 + $0x60] sm:$0xff] }
 0x2ba   :  { %v518_v22 = vadd.f32 %v1645_v55, %v517_v11  ;;  %v2067_v47 = vld [vmem:[%s2257_s3 + $0x80] sm:$0xff] }
 0x2bb   :  { %v488_v26 = vadd.f32 %v1647_v56, %v487_v18 }
 0x2bc   :  { %v1649_v30 = vpop.eup %1648  ;;  %v522_v32 = vsel %vm521_vm11, %v1645_v55, %v518_v22  ;;  %v2031_v22 = vld [vmem:[%s2257_s3 + $0xa0] sm:$0xff] }
 0x2bd   :  { %v527_v35 = vsel %vm524_vm13, %v526_v24, %v522_v32  ;;  %v500_v36 = vmul.f32 %v1649_v30, %v465_v59  ;;  %v492_v37 = vsel %vm491_vm14, %v1647_v56, %v488_v26  ;;  %vm505_vm2 = vweird.f32 %v1649_v30  ;;  %v198_v56 = vpop.f32.mrf.mxu0  ;;  %v1933_v59 = vld [vmem:[%s2257_s3 + $0x78] sm:$0xff] }
 0x2be   :  { %v528_v38 = vmul.f32 %v1892_v27, %v527_v35  ;;  %v497_v41 = vsel %vm494_vm15, %v496_v33, %v492_v37  ;;  %vm506_vm4 = vmor %vm504_vm3, %vm505_vm2 }
 0x2bf   :  { %v501_v42 = vsub.f32 1.0, %v500_v36  ;;  %v498_v43 = vmul.f32 %v1894_v29, %v497_v41  ;;  %v1920_v53 = vpop.permute.xlu0 %112  ;;  %v2050_v41 = vld [vmem:[%s2257_s3 + $0x98] sm:$0xff] }
 0x2c0   :  { %1585 = vmatpush.xpose.msk.msrb.mxu2 %vm233_vm1, %v528_v38  ;;  %v196_v55 = vadd.f32 %v195_v50, %v1920_v53 }
 0x2c1   :  { %v502_v46 = vmul.f32 %v1649_v30, %v501_v42  ;;  %1581 = vmatpush.xpose.msk.msrb.mxu3 %vm233_vm1, %v498_v43  ;;  %v2055_v42 = vld [vmem:[%s2257_s3 + $0x90] sm:$0xff] }
 0x2c3   :  { %v503_v51 = vadd.f32 %v1649_v30, %v502_v46 }
 0x2c4   :  { %1582 = vmatmul.msk.f32.vlgmr.msrb.gmra.mxu3 %vm233_vm1, %v193_v49 }
 0x2c5   :  { %v507_v27 = vsel %vm506_vm4, %v1649_v30, %v503_v51  ;;  %681 = vmatpush.msra.mxu3 %v1933_v59 }
 0x2c6   :  { %v512_v29 = vsel %vm509_vm5, %v511_v52, %v507_v27 }
 0x2c7   :  { %v513_v54 = vmul.f32 %v1900_v34, %v512_v29  ;;  %v1938_v34 = vld [vmem:[%s2257_s3 + $0x70] sm:$0xff] }
 0x2c8   :  { %682 = vmatpush.msra.mxu3 %v1938_v34 }
 0x2c9   :  { %1583 = vmatpush.xpose.msk.msrb.mxu1 %vm233_vm1, %v513_v54 }
 0x2ca   :  { %683 = vmatpush.msra.mxu3 %v1944_v61 }
 0x2cc   :  { %1584 = vmatmul.msk.f32.vlgmr.msrb.gmra.mxu1 %vm233_vm1, %v196_v55  ;;  %684 = vmatpush.msra.mxu3 %v1950_v2 }
 0x2cd   :  { %v1926_v57 = vpop.permute.xlu1 %117  ;;  %756 = vmatpush.msra.mxu1 %v2050_v41 }
 0x2ce   :  { %v199_v58 = vadd.f32 %v198_v56, %v1926_v57  ;;  %1621 = vmatpush.xpose.msk.msrb.mxu3 %vm120_vm0, %v1957_v16 }
 0x2cf   :  { %757 = vmatpush.msra.mxu1 %v2055_v42 }
 0x2d0   :  { %1586 = vmatmul.msk.f32.vlgmr.msrb.gmra.mxu2 %vm233_vm1, %v199_v58 }
 0x33b   :  { %v552_v63 = vpop.f32.mrf.mxu2 }
 0x33c   :  { %634 = vxpose.xlu2.b32.start [1/4] (short) (narrow) %v552_v63, 8 }
 0x347   :  { %v578_v12 = vpop.f32.mrf.mxu3 }
 0x348   :  { %635 = vxpose.xlu2.b32.cont [2/4] (short) (narrow) %v578_v12, 8 }
 0x349   :  { %v604_v11 = vpop.f32.mrf.mxu1 }
 0x350   :  { %636 = vxpose.xlu2.b32.cont [3/4] (short) (narrow) %v604_v11, 8 }
 0x353   :  { %v630_v15 = vpop.f32.mrf.mxu2 }
 0x358   :  { %637 = vxpose.xlu2.b32.end [4/4] (short) (narrow) %v630_v15, 8  ;;  %v2076_v15 = vld [vmem:[%s2258_s4 + $0x3] sm:$0x1] }
 0x3d9   :  { %v650_v18 = vpop.trf.xlu2 }
 0x3da   :  { %1587 = vmatmul.msk.f32.vlgmr.msra.gmra.mxu3 %vm120_vm0, %v650_v18  ;;  %v2081_v18 = vld [vmem:[%s2256_s2] sm:$0xf] }
 0x3e2   :  { %1597 = vmatmul.msk.f32.vlgmr.msrb.gmra.mxu3 %vm120_vm0, %v1764_v4  ;;  %v1988_v4 = vld [vmem:[%s2257_s3 + $0xd0] sm:$0xff] }
 0x3ea   :  { %1598 = vmatmul.msk.f32.gmra.mxu3 %vm120_vm0, %v1758_v3  ;;  %v1983_v3 = vld [vmem:[%s2257_s3 + $0xd8] sm:$0xff] }
 0x3eb   :  { %778 = vmatpush.msra.mxu2 %v1983_v3 }
 0x3ed   :  { %779 = vmatpush.msra.mxu2 %v1988_v4 }
 0x3f2   :  { %1599 = vmatmul.msk.f32.gmra.mxu3 %vm120_vm0, %v1785_v7  ;;  %v1994_v7 = vld [vmem:[%s2257_s3 + $0xc8] sm:$0xff] }
 0x3f3   :  { %780 = vmatpush.msra.mxu2 %v1994_v7 }
 0x3fa   :  { %1600 = vmatmul.msk.f32.gmra.mxu3 %vm120_vm0, %v1793_v8  ;;  %v2001_v8 = vld [vmem:[%s2257_s3 + $0xc0] sm:$0xff] }
 0x3fb   :  { %781 = vmatpush.msra.mxu2 %v2001_v8 }
 0x402   :  { %1601 = vmatmul.msk.f32.gmra.mxu3 %vm120_vm0, %v1798_v9  ;;  %v2006_v9 = vld [vmem:[%s2257_s3 + $0xb8] sm:$0xff] }
 0x403   :  { %782 = vmatpush.msra.mxu2 %v2006_v9 }
 0x40a   :  { %1602 = vmatmul.msk.f32.gmra.mxu3 %vm120_vm0, %v1853_v44  ;;  %v2012_v44 = vld [vmem:[%s2257_s3 + $0xb0] sm:$0xff] }
 0x40b   :  { %783 = vmatpush.msra.mxu2 %v2012_v44 }
 0x412   :  { %1603 = vmatmul.msk.f32.gmra.mxu3 %vm120_vm0, %v1863_v48  ;;  %v2018_v48 = vld [vmem:[%s2258_s4] ss:$0 sm:$0xff] }
 0x41a   :  { %1604 = vmatmul.msk.f32.gmra.mxu3 %vm120_vm0, %v1880_v62  ;;  %v2023_v62 = vld [vmem:[%s2257_s3 + $0xa8] sm:$0xff] }
 0x41b   :  { %784 = vmatpush.msra.mxu2 %v2023_v62 }
 0x41d   :  { %785 = vmatpush.msra.mxu2 %v2031_v22 }
 0x422   :  { %1605 = vmatmul.msk.f32.gmra.mxu3 %vm120_vm0, %v1888_v19 }
 0x45d   :  { %v686_v19 = vpop.f32.mrf.mxu3 }
 0x45e   :  { %v687_v21 = vadd.f32 %v2018_v48, %v686_v19 }
 0x460   :  { %v2035_v23 = vadd.f32 %v687_v21, %v1746_v0  ;;  %v690_v21 = vadd.f32 %v2081_v18, %v2076_v15 }
 0x462   :  { %v695_v24 = vsel %vm120_vm0, %v2035_v23, 0.0  ;;  %v698_v26 = vmul.f32 %v2035_v23, %v2035_v23 }
 0x463   :  { %696 = vadd.xlane.f32.xlu1 %v695_v24  ;;  %v692_v24 = vrot.slane %v2081_v18, 1 }
 0x464   :  { %v699_v30 = vsel %vm120_vm0, %v698_v26, 0.0 }
 0x465   :  { %v2042_v32 = vpop.f32.mrf.mxu3  ;;  %700 = vadd.xlane.f32.xlu0 %v699_v30  ;;  %v2089_v30 = vld [vmem:[%s2258_s4 + $0x4] sm:$0x1] }
 0x46d   :  { %v882_v33 = vpop.f32.mrf.mxu3 }
 0x475   :  { %v2044_v35 = vpop.f32.mrf.mxu3 }
 0x47d   :  { %v888_v36 = vpop.f32.mrf.mxu3 }
 0x47e   :  { %v889_v37 = vadd.f32 %v888_v36, %v1832_v28  ;;  %v2061_v28 = vld [vmem:[%s2257_s3 + $0x88] sm:$0xff] }
 0x47f   :  { %758 = vmatpush.msra.mxu1 %v2061_v28 }
 0x480   :  { %1066 = vmatpush.msrb.mxu2 %v889_v37  ;;  %v720_v37 = vperm.slane %v690_v21, 0 }
 0x481   :  { %759 = vmatpush.msra.mxu1 %v2067_v47 }
 0x483   :  { %1593 = vmatpush.xpose.msk.msrb.mxu1 %vm120_vm0, %v1957_v16 }
 0x4d6   :  { %v697_v0 = vpop.xlane.xlu1 %696 }
 0x4d7   :  { %v702_v38 = vmul.f32 0.03125, %v697_v0 }
 0x4d8   :  { %v701_v45 = vpop.xlane.xlu0 %700 }
 0x4d9   :  { %v703_v43 = vmul.f32 %v702_v38, %v697_v0  ;;  %v719_v0 = vsub.f32 %v2035_v23, %v702_v38  ;;  %v883_v23 = vadd.f32 %v882_v33, %v1817_v13  ;;  %v886_v38 = vadd.f32 %v2044_v35, %v1829_v25  ;;  %v2109_v13 = vld [vmem:[%s2258_s4 + $0x1] ss:$0 sm:$0xff] }
 0x4db   :  { %v704_v46 = vsub.f32 %v701_v45, %v703_v43  ;;  %v694_v45 = vadd.f32 %v692_v24, %v2089_v30 }
 0x4dd   :  { %v705_v49 = vmul.f32 0.032258064, %v704_v46 }
 0x4df   :  { %v706_v50 = vmax.f32 %v705_v49, 0.0 }
 0x4e1   :  { %1650 = vrsqrt.f32 %v706_v50  ;;  %vm714_vm6 = vcmp.eq.f32.partialorder %v706_v50, inf  ;;  %v717_v58 = vand.u32 2147483648, %v706_v50  ;;  %vm716_vm7 = vcmp.eq.f32.partialorder %v706_v50, 0.0 }
 0x4e7   :  { %v1651_v51 = vpop.eup %1650 }
 0x4e8   :  { %v708_v52 = vmul.f32 %v1651_v51, %v706_v50 }
 0x4ea   :  { %v709_v27 = vmul.f32 %v1651_v51, %v708_v52  ;;  %v721_v52 = vmul.f32 %v720_v37, %v719_v0 }
 0x4ec   :  { %v710_v29 = vmul.f32 0.5, %v709_v27 }
 0x4ee   :  { %v711_v54 = vsub.f32 1.5, %v710_v29  ;;  %v738_v29 = vperm.slane %v694_v45, 0 }
 0x4f0   :  { %v712_v55 = vmul.f32 %v1651_v51, %v711_v54 }
 0x4f2   :  { %v713_v56 = vmul.f32 %v712_v55, %v706_v50 }
 0x4f4   :  { %v715_v63 = vsel %vm714_vm6, %v706_v50, %v713_v56 }
 0x4f5   :  { %v718_v12 = vsel %vm716_vm7, %v717_v58, %v715_v63 }
 0x4f6   :  { %v722_v11 = vadd.f32 1e-06, %v718_v12  ;;  %v880_v12 = vadd.f32 %v2042_v32, %v1825_v20 }
 0x4f8   :  { %1652 = vrcp.f32 %v722_v11  ;;  %v734_v43 = vand.u32 2147483648, %v722_v11  ;;  %v732_v49 = vand.u32 2147483647, %v722_v11  ;;  %vm728_vm9 = vweird.f32 %v722_v11 }
 0x4fa   :  { %v735_v51 = vor.u32 1.1754944e-38, %v734_v43  ;;  %vm733_vm11 = vcmp.eq.f32.partialorder %v732_v49, 8.507059e+37 }
 0x4fe   :  { %v1653_v19 = vpop.eup %1652 }
 0x4ff   :  { %v724_v26 = vmul.f32 %v1653_v19, %v722_v11  ;;  %vm729_vm8 = vweird.f32 %v1653_v19 }
 0x500   :  { %vm730_vm10 = vmor %vm728_vm9, %vm729_vm8 }
 0x501   :  { %v725_v36 = vsub.f32 1.0, %v724_v26 }
 0x503   :  { %v726_v46 = vmul.f32 %v1653_v19, %v725_v36 }
 0x505   :  { %v727_v50 = vadd.f32 %v1653_v19, %v726_v46 }
 0x507   :  { %v731_v27 = vsel %vm730_vm10, %v1653_v19, %v727_v50  ;;  %v891_v19 = vpop.f32.mrf.mxu3 }
 0x508   :  { %v736_v54 = vsel %vm733_vm11, %v735_v51, %v731_v27  ;;  %v892_v21 = vadd.f32 %v891_v19, %v1835_v31 }
 0x509   :  { %v737_v55 = vmul.f32 %v736_v54, %v721_v52 }
 0x50b   :  { %v2093_v56 = vadd.f32 %v738_v29, %v737_v55 }
 0x50d   :  { %1588 = vmatmul.msk.f32.vlgmr.msra.gmra.mxu1 %vm120_vm0, %v2093_v56 }
 0x50e   :  { %956 = vmatpush.msra.mxu1 %v883_v23 }
 0x515   :  { %1594 = vmatmul.msk.f32.vlgmr.msrb.gmra.mxu1 %vm120_vm0, %v1751_v1 }
 0x516   :  { %1011 = vmatpush.msrb.mxu1 %v886_v38 }
 0x51d   :  { %1595 = vmatmul.msk.f32.gmra.mxu1 %vm120_vm0, %v1773_v5 }
 0x525   :  { %1596 = vmatmul.msk.f32.gmra.mxu1 %vm120_vm0, %v1778_v6 }
 0x58a   :  { %v761_v33 = vpop.f32.mrf.mxu1 }
 0x58b   :  { %v762_v58 = vadd.f32 %v2109_v13, %v761_v33 }
 0x58d   :  { %v764_v25 = vmax.f32 %v762_v58, 0.0 }
 0x58f   :  { %1589 = vmatmul.msk.f32.vlgmr.msra.gmra.mxu2 %vm766_vm12, %v764_v25 }
 0x592   :  { %v870_v1 = vpop.f32.mrf.mxu1 }
 0x593   :  { %v871_v35 = vadd.f32 %v870_v1, %v1814_v10 }
 0x595   :  { %906 = vxpose.xlu1.b32.start.end [1/1] (short) (narrow) %v871_v35, 8 }
 0x59a   :  { %v873_v5 = vpop.f32.mrf.mxu1 }
 0x59b   :  { %v874_v63 = vadd.f32 %v873_v5, %v1819_v14 }
 0x59d   :  { %961 = vxpose.xlu2.b32.start.end [1/1] (short) (narrow) %v874_v63, 8 }
 0x5a2   :  { %v876_v6 = vpop.f32.mrf.mxu1 }
 0x5a3   :  { %v877_v11 = vadd.f32 %v876_v6, %v1822_v17  ;;  %v1591_v17 = vld [vmem:[%s2255_s1 + $0x1] sm:$0x1] }
 0x5a4   :  { %vm847_vm13 = vcmp.gt.s32.totalorder %v1591_v17, 0 }
 0x5a5   :  { %1016 = vxpose.xlu0.b32.start.end [1/1] (short) (narrow) %v877_v11, 8  ;;  %1071 = vxpose.xlu2.b32.start.end [1/1] (short) (narrow) %v880_v12, 8  ;;  %v1130_v20 = vsel %vm847_vm13, 1, %v1709_v39 }
 0x5a6   :  { %v1131_v31 = vperm.slane %v1130_v20, 0 }
 0x5a8   :  { %vm2127_vm14 = vcmp.eq.s32.totalorder %v1131_v31, 1 }
 0x612   :  { %v2137_v50 = vpop.f32.mrf.mxu2 }
 0x636   :  { %v977_v10 = vpop.trf.xlu2 }
 0x639   :  { %v922_v24 = vpop.trf.xlu1 }
 0x63a   :  { %1606 = vmatmul.msk.f32.vlgmr.msra.gmra.mxu1 %vm233_vm1, %v922_v24 }
 0x63b   :  { %1121 = vmatpush.msra.mxu1 %v892_v21 }
 0x63e   :  { %v1087_v14 = vpop.trf.xlu2 }
 0x642   :  { %1607 = vmatmul.msk.f32.vlgmr.msrb.gmra.mxu1 %vm233_vm1, %v977_v10 }
 0x649   :  { %v1032_v26 = vpop.trf.xlu0 }
 0x64a   :  { %1608 = vmatmul.msk.f32.vlgmr.msrb.gmra.mxu2 %vm233_vm1, %v1032_v26  ;;  %1609 = vmatmul.msk.f32.vlgmr.msra.gmra.mxu1 %vm233_vm1, %v1087_v14 }
 0x6b7   :  { %v958_v32 = vpop.f32.mrf.mxu1 }
 0x6b8   :  { %v1126_v37 = vmul.f32 0.35355338, %v958_v32 }
 0x6ba   :  { %v1133_v0 = vsel %vm2127_vm14, -1e+09, %v1126_v37  ;;  %v894_v37 = vpop.f32.mrf.mxu3 }
 0x6bb   :  { %v1137_v43 = vsel %vm233_vm1, %v1133_v0, -inf }
 0x6bc   :  { %1138 = vmax.xlane.f32.xlu2 %v1137_v43 }
 0x6bf   :  { %v1013_v45 = vpop.f32.mrf.mxu1 }
 0x6c0   :  { %v1127_v46 = vmul.f32 0.35355338, %v1013_v45 }
 0x6c2   :  { %v1134_v49 = vsel %vm2127_vm14, -1e+09, %v1127_v46 }
 0x6c3   :  { %v1140_v39 = vsel %vm233_vm1, %v1134_v49, -inf }
 0x6c4   :  { %1141 = vmax.xlane.f32.xlu1 %v1140_v39 }
 0x6c7   :  { %v1123_v51 = vpop.f32.mrf.mxu1 }
 0x6c8   :  { %v1129_v52 = vmul.f32 0.35355338, %v1123_v51 }
 0x6ca   :  { %v1136_v27 = vsel %vm2127_vm14, -1e+09, %v1129_v52  ;;  %v897_v52 = vpop.f32.mrf.mxu3 }
 0x6cb   :  { %v1146_v29 = vsel %vm233_vm1, %v1136_v27, -inf }
 0x6cc   :  { %1147 = vmax.xlane.f32.xlu2 %v1146_v29 }
 0x6cd   :  { %v1068_v54 = vpop.f32.mrf.mxu2 }
 0x6ce   :  { %v1128_v55 = vmul.f32 0.35355338, %v1068_v54 }
 0x6d0   :  { %v1135_v23 = vsel %vm2127_vm14, -1e+09, %v1128_v55 }
 0x6d1   :  { %v1143_v38 = vsel %vm233_vm1, %v1135_v23, -inf }
 0x6d2   :  { %1144 = vmax.xlane.f32.xlu0 %v1143_v38 }
 0x72f   :  { %v1139_v33 = vpop.xlane.xlu2 %1138 }
 0x730   :  { %v1149_v58 = vsub.f32 %v1133_v0, %v1139_v33 }
 0x732   :  { %v1153_v25 = vmul.f32 1.442695, %v1149_v58 }
 0x734   :  { %1654 = vpow2.f32 %v1153_v25 }
 0x737   :  { %v1142_v1 = vpop.xlane.xlu1 %1141 }
 0x738   :  { %v1150_v35 = vsub.f32 %v1134_v49, %v1142_v1 }
 0x73a   :  { %v1655_v5 = vpop.eup %1654  ;;  %v1155_v63 = vmul.f32 1.442695, %v1150_v35 }
 0x73b   :  { %v1161_v6 = vsel %vm233_vm1, %v1655_v5, 0.0 }
 0x73c   :  { %1656 = vpow2.f32 %v1155_v63  ;;  %1162 = vadd.xlane.f32.xlu2 %v1161_v6  ;;  %v895_v6 = vadd.f32 %v894_v37, %v1910_v60 }
 0x73f   :  { %v1148_v12 = vpop.xlane.xlu2 %1147 }
 0x740   :  { %v1152_v11 = vsub.f32 %v1136_v27, %v1148_v12 }
 0x742   :  { %v1657_v19 = vpop.eup %1656  ;;  %v1159_v21 = vmul.f32 1.442695, %v1152_v11 }
 0x743   :  { %v1164_v24 = vsel %vm233_vm1, %v1657_v19, 0.0 }
 0x744   :  { %1658 = vpow2.f32 %v1159_v21  ;;  %1165 = vadd.xlane.f32.xlu0 %v1164_v24 }
 0x745   :  { %v1145_v10 = vpop.xlane.xlu0 %1144 }
 0x746   :  { %v1151_v14 = vsub.f32 %v1135_v23, %v1145_v10  ;;  %v900_v10 = vpop.f32.mrf.mxu3 }
 0x748   :  { %v1157_v26 = vmul.f32 1.442695, %v1151_v14 }
 0x74a   :  { %v2147_v17 = vpop.eup %1658  ;;  %1660 = vpow2.f32 %v1157_v26 }
 0x74b   :  { %v1170_v20 = vsel %vm233_vm1, %v2147_v17, 0.0 }
 0x74c   :  { %1171 = vadd.xlane.f32.xlu2 %v1170_v20 }
 0x750   :  { %v2151_v31 = vpop.eup %1660 }
 0x751   :  { %v1167_v32 = vsel %vm233_vm1, %v2151_v31, 0.0 }
 0x752   :  { %1168 = vadd.xlane.f32.xlu1 %v1167_v32 }
 0x7af   :  { %v1163_v36 = vpop.xlane.xlu2 %1162 }
 0x7b0   :  { %1662 = vrcp.f32 %v1163_v36  ;;  %v1184_v49 = vand.u32 2147483648, %v1163_v36  ;;  %v1182_v51 = vand.u32 2147483647, %v1163_v36  ;;  %vm1178_vm2 = vweird.f32 %v1163_v36 }
 0x7b2   :  { %v1185_v54 = vor.u32 1.1754944e-38, %v1184_v49  ;;  %vm1183_vm4 = vcmp.eq.f32.partialorder %v1182_v51, 8.507059e+37 }
 0x7b6   :  { %v1663_v0 = vpop.eup %1662 }
 0x7b7   :  { %v1174_v43 = vmul.f32 %v1663_v0, %v1163_v36  ;;  %v1166_v45 = vpop.xlane.xlu0 %1165  ;;  %vm1179_vm15 = vweird.f32 %v1663_v0 }
 0x7b8   :  { %1664 = vrcp.f32 %v1166_v45  ;;  %vm1180_vm3 = vmor %vm1178_vm2, %vm1179_vm15  ;;  %v1199_v1 = vand.u32 2147483648, %v1166_v45  ;;  %v1197_v63 = vand.u32 2147483647, %v1166_v45  ;;  %vm1193_vm6 = vweird.f32 %v1166_v45 }
 0x7b9   :  { %v1175_v46 = vsub.f32 1.0, %v1174_v43  ;;  %v898_v43 = vadd.f32 %v897_v52, %v1907_v40 }
 0x7ba   :  { %v1200_v24 = vor.u32 1.1754944e-38, %v1199_v1  ;;  %vm1198_vm8 = vcmp.eq.f32.partialorder %v1197_v63, 8.507059e+37 }
 0x7bb   :  { %v1176_v39 = vmul.f32 %v1663_v0, %v1175_v46 }
 0x7bd   :  { %v1177_v27 = vadd.f32 %v1663_v0, %v1176_v39 }
 0x7be   :  { %v1665_v29 = vpop.eup %1664 }
 0x7bf   :  { %v1181_v55 = vsel %vm1180_vm3, %v1663_v0, %v1177_v27  ;;  %v1189_v23 = vmul.f32 %v1665_v29, %v1166_v45  ;;  %v1172_v38 = vpop.xlane.xlu2 %1171  ;;  %vm1194_vm5 = vweird.f32 %v1665_v29 }
 0x7c0   :  { %v1186_v33 = vsel %vm1183_vm4, %v1185_v54, %v1181_v55  ;;  %1666 = vrcp.f32 %v1172_v38  ;;  %vm1195_vm7 = vmor %vm1193_vm6, %vm1194_vm5  ;;  %v1229_v36 = vand.u32 2147483648, %v1172_v38  ;;  %v1227_v60 = vand.u32 2147483647, %v1172_v38 }
 0x7c1   :  { %v1190_v58 = vsub.f32 1.0, %v1189_v23  ;;  %v1187_v25 = vmul.f32 %v1655_v5, %v1186_v33  ;;  %vm1223_vm10 = vweird.f32 %v1172_v38 }
 0x7c2   :  { %v1230_v49 = vor.u32 1.1754944e-38, %v1229_v36  ;;  %vm1228_vm13 = vcmp.eq.f32.partialorder %v1227_v60, 8.507059e+37 }
 0x7c3   :  { %v1191_v35 = vmul.f32 %v1665_v29, %v1190_v58  ;;  %1610 = vmatpush.xpose.msk.msra.mxu2 %vm233_vm1, %v1187_v25 }
 0x7c5   :  { %v1192_v12 = vadd.f32 %v1665_v29, %v1191_v35  ;;  %v1169_v11 = vpop.xlane.xlu1 %1168 }
 0x7c6   :  { %v1667_v21 = vpop.eup %1666  ;;  %1668 = vrcp.f32 %v1169_v11  ;;  %1611 = vmatmul.msk.f32.vlgmr.msra.gmra.mxu2 %vm233_vm1, %v895_v6  ;;  %v1214_v27 = vand.u32 2147483648, %v1169_v11  ;;  %v1212_v55 = vand.u32 2147483647, %v1169_v11  ;;  %vm1208_vm15 = vweird.f32 %v1169_v11 }
 0x7c7   :  { %v1196_v14 = vsel %vm1195_vm7, %v1665_v29, %v1192_v12  ;;  %v1219_v5 = vmul.f32 %v1667_v21, %v1172_v38  ;;  %vm1224_vm9 = vweird.f32 %v1667_v21  ;;  %v903_v29 = vpop.f32.mrf.mxu3 }
 0x7c8   :  { %v1201_v26 = vsel %vm1198_vm8, %v1200_v24, %v1196_v14  ;;  %vm1225_vm11 = vmor %vm1223_vm10, %vm1224_vm9  ;;  %v904_v40 = vadd.f32 %v903_v29, %v1926_v57  ;;  %v1215_v52 = vor.u32 1.1754944e-38, %v1214_v27  ;;  %vm1213_vm3 = vcmp.eq.f32.partialorder %v1212_v55, 8.507059e+37 }
 0x7c9   :  { %v1220_v20 = vsub.f32 1.0, %v1219_v5  ;;  %v1202_v32 = vmul.f32 %v1657_v19, %v1201_v26 }
 0x7cb   :  { %v1221_v0 = vmul.f32 %v1667_v21, %v1220_v20  ;;  %1612 = vmatpush.xpose.msk.msrb.mxu1 %vm233_vm1, %v1202_v32 }
 0x7cc   :  { %v1669_v37 = vpop.eup %1668 }
 0x7cd   :  { %v1222_v45 = vadd.f32 %v1667_v21, %v1221_v0  ;;  %v1204_v46 = vmul.f32 %v1669_v37, %v1169_v11  ;;  %vm1209_vm14 = vweird.f32 %v1669_v37 }
 0x7ce   :  { %1613 = vmatmul.msk.f32.vlgmr.msrb.gmra.mxu1 %vm233_vm1, %v898_v43  ;;  %vm1210_vm2 = vmor %vm1208_vm15, %vm1209_vm14 }
 0x7cf   :  { %v1226_v39 = vsel %vm1225_vm11, %v1667_v21, %v1222_v45  ;;  %v1205_v51 = vsub.f32 1.0, %v1204_v46 }
 0x7d0   :  { %v1231_v19 = vsel %vm1228_vm13, %v1230_v49, %v1226_v39 }
 0x7d1   :  { %v1206_v54 = vmul.f32 %v1669_v37, %v1205_v51  ;;  %v1232_v23 = vmul.f32 %v2147_v17, %v1231_v19  ;;  %v901_v17 = vadd.f32 %v900_v10, %v1920_v53  ;;  %v2216_v19 = vld [vmem:[%s2256_s2 + $0x4] sm:$0xf] }
 0x7d3   :  { %v1207_v33 = vadd.f32 %v1669_v37, %v1206_v54  ;;  %1616 = vmatpush.xpose.msk.msra.mxu1 %vm233_vm1, %v1232_v23  ;;  %v1393_v54 = vadd.f32 %v2216_v19, %v2076_v15  ;;  %v1395_v23 = vrot.slane %v2216_v19, 1 }
 0x7d5   :  { %v1211_v38 = vsel %vm1210_vm2, %v1669_v37, %v1207_v33 }
 0x7d6   :  { %v1216_v58 = vsel %vm1213_vm3, %v1215_v52, %v1211_v38  ;;  %1617 = vmatmul.msk.f32.vlgmr.msra.gmra.mxu1 %vm233_vm1, %v904_v40 }
 0x7d7   :  { %1458 = vmatpush.msrb.mxu1 %v2050_v41  ;;  %v1217_v25 = vmul.f32 %v2151_v31, %v1216_v58 }
 0x7d9   :  { %1459 = vmatpush.msrb.mxu1 %v2055_v42  ;;  %1614 = vmatpush.xpose.msk.msrb.mxu2 %vm233_vm1, %v1217_v25  ;;  %v1423_v25 = vperm.slane %v1393_v54, 0 }
 0x7db   :  { %1460 = vmatpush.msrb.mxu1 %v2061_v28 }
 0x7dc   :  { %1615 = vmatmul.msk.f32.vlgmr.msrb.gmra.mxu2 %vm233_vm1, %v901_v17 }
 0x7dd   :  { %1384 = vmatpush.msra.mxu2 %v1933_v59  ;;  %1461 = vmatpush.msrb.mxu1 %v2067_v47 }
 0x7df   :  { %1385 = vmatpush.msra.mxu2 %v1938_v34 }
 0x7e1   :  { %1386 = vmatpush.msra.mxu2 %v1944_v61 }
 0x7e3   :  { %1387 = vmatpush.msra.mxu2 %v1950_v2 }
 0x7e5   :  { %1478 = vmatpush.msrb.mxu2 %v1983_v3  ;;  %v2189_v3 = vld [vmem:[%s2258_s4 + $0x2] ss:$0 sm:$0xff] }
 0x7e7   :  { %1479 = vmatpush.msrb.mxu2 %v1988_v4 }
 0x7e9   :  { %1480 = vmatpush.msrb.mxu2 %v1994_v7 }
 0x7eb   :  { %1481 = vmatpush.msrb.mxu2 %v2001_v8  ;;  %v788_v8 = vadd.f32 %v2189_v3, %v2137_v50 }
 0x7ed   :  { %1482 = vmatpush.msrb.mxu2 %v2006_v9 }
 0x7ef   :  { %1483 = vmatpush.msrb.mxu2 %v2012_v44 }
 0x7f1   :  { %1484 = vmatpush.msrb.mxu2 %v2023_v62 }
 0x7f3   :  { %1485 = vmatpush.msrb.mxu2 %v2031_v22  ;;  %v2203_v22 = vadd.f32 %v788_v8, %v2093_v56 }
 0x849   :  { %v1256_v53 = vpop.f32.mrf.mxu2 }
 0x84a   :  { %1337 = vxpose.xlu1.b32.start [1/4] (short) (narrow) %v1256_v53, 8 }
 0x84b   :  { %v1282_v57 = vpop.f32.mrf.mxu1 }
 0x852   :  { %1338 = vxpose.xlu1.b32.cont [2/4] (short) (narrow) %v1282_v57, 8 }
 0x853   :  { %v1334_v34 = vpop.f32.mrf.mxu1 }
 0x85f   :  { %v1308_v59 = vpop.f32.mrf.mxu2 }
 0x860   :  { %1339 = vxpose.xlu1.b32.cont [3/4] (short) (narrow) %v1308_v59, 8  ;;  %v1397_v59 = vadd.f32 %v1395_v23, %v2089_v30 }
 0x868   :  { %1340 = vxpose.xlu1.b32.end [4/4] (short) (narrow) %v1334_v34, 8 }
 0x8f4   :  { %v1353_v61 = vpop.trf.xlu1 }
 0x8f5   :  { %1618 = vmatmul.msk.f32.vlgmr.msra.gmra.mxu2 %vm120_vm0, %v1353_v61 }
 0x978   :  { %v1389_v2 = vpop.f32.mrf.mxu2 }
 0x979   :  { %v1390_v4 = vadd.f32 %v2018_v48, %v1389_v2  ;;  %v800_v48 = vmul.f32 %v2203_v22, %v2203_v22  ;;  %v791_v2 = vrot.slane %v2081_v18, 2 }
 0x97b   :  { %v2193_v7 = vadd.f32 %v1957_v16, %v1390_v4  ;;  %v797_v16 = vsel %vm120_vm0, %v2203_v22, 0.0  ;;  %v801_v41 = vsel %vm120_vm0, %v800_v48, 0.0 }
 0x97d   :  { %v1398_v9 = vsel %vm120_vm0, %v2193_v7, 0.0  ;;  %v1401_v44 = vmul.f32 %v2193_v7, %v2193_v7 }
 0x97e   :  { %1399 = vadd.xlane.f32.xlu0 %v1398_v9  ;;  %v2227_v9 = vld [vmem:[%s2258_s4 + $0x5] sm:$0x1] }
 0x97f   :  { %v1402_v62 = vsel %vm120_vm0, %v1401_v44, 0.0  ;;  %v1441_v44 = vperm.slane %v1397_v59, 0  ;;  %v793_v48 = vadd.f32 %v791_v2, %v2227_v9  ;;  %v1494_v59 = vrot.slane %v2216_v19, 3 }
 0x980   :  { %1403 = vadd.xlane.f32.xlu2 %v1402_v62 }
 0x986   :  { %798 = vadd.xlane.f32.xlu0 %v797_v16 }
 0x98e   :  { %802 = vadd.xlane.f32.xlu0 %v801_v41  ;;  %v794_v41 = vrot.slane %v2081_v18, 3 }
 0x9f1   :  { %v1400_v42 = vpop.xlane.xlu0 %1399 }
 0x9f2   :  { %v1405_v28 = vmul.f32 0.03125, %v1400_v42 }
 0x9f3   :  { %v1404_v50 = vpop.xlane.xlu2 %1403 }
 0x9f4   :  { %v1406_v47 = vmul.f32 %v1405_v28, %v1400_v42  ;;  %v1422_v17 = vsub.f32 %v2193_v7, %v1405_v28 }
 0x9f6   :  { %v1407_v31 = vsub.f32 %v1404_v50, %v1406_v47  ;;  %v1424_v8 = vmul.f32 %v1423_v25, %v1422_v17  ;;  %v2234_v47 = vld [vmem:[%s2258_s4 + $0x6] sm:$0x1]  ;;  %v1491_v17 = vrot.slane %v2216_v19, 2  ;;  %s1710_s4 = smov [#allocation2]  }
 0x9f7   :  { %s1548_s20 = sshll.u32 %s1710_s4, 4  ;;  %s1549_s20 = int_to_ptr.vmem [resolvable:$true] %s1548_s20 }
 0x9f8   :  { %v1408_v1 = vmul.f32 0.032258064, %v1407_v31  ;;  %v822_v31 = vperm.slane %v793_v48, 0 }
 0x9f9   :  { %v799_v35 = vpop.xlane.xlu0 %798 }
 0x9fa   :  { %v1409_v63 = vmax.f32 %v1408_v1, 0.0  ;;  %v2210_v56 = vmul.f32 0.03125, %v799_v35 }
 0x9fc   :  { %1670 = vrsqrt.f32 %v1409_v63  ;;  %v805_v6 = vmul.f32 %v2210_v56, %v799_v35  ;;  %vm1417_vm1 = vcmp.eq.f32.partialorder %v1409_v63, inf  ;;  %v1420_v60 = vand.u32 2147483648, %v1409_v63 }
 0x9fd   :  { %vm1419_vm4 = vcmp.eq.f32.partialorder %v1409_v63, 0.0  ;;  %v821_v1 = vsub.f32 %v2203_v22, %v2210_v56 }
 0xa01   :  { %v803_v12 = vpop.xlane.xlu0 %802 }
 0xa02   :  { %v1671_v11 = vpop.eup %1670  ;;  %v806_v21 = vsub.f32 %v803_v12, %v805_v6 }
 0xa03   :  { %v1411_v24 = vmul.f32 %v1671_v11, %v1409_v63 }
 0xa04   :  { %v807_v10 = vmul.f32 0.032258064, %v806_v21  ;;  %v823_v21 = vmul.f32 %v822_v31, %v821_v1 }
 0xa05   :  { %v1412_v14 = vmul.f32 %v1671_v11, %v1411_v24 }
 0xa06   :  { %v808_v5 = vmax.f32 %v807_v10, 0.0 }
 0xa07   :  { %v1413_v26 = vmul.f32 0.5, %v1412_v14 }
 0xa08   :  { %1672 = vrsqrt.f32 %v808_v5  ;;  %vm816_vm5 = vcmp.eq.f32.partialorder %v808_v5, inf  ;;  %v819_v33 = vand.u32 2147483648, %v808_v5  ;;  %vm818_vm6 = vcmp.eq.f32.partialorder %v808_v5, 0.0 }
 0xa09   :  { %v1414_v20 = vsub.f32 1.5, %v1413_v26 }
 0xa0b   :  { %v1415_v32 = vmul.f32 %v1671_v11, %v1414_v20 }
 0xa0d   :  { %v1416_v36 = vmul.f32 %v1415_v32, %v1409_v63 }
 0xa0e   :  { %v1673_v0 = vpop.eup %1672 }
 0xa0f   :  { %v1418_v37 = vsel %vm1417_vm1, %v1409_v63, %v1416_v36  ;;  %v810_v43 = vmul.f32 %v1673_v0, %v808_v5  ;;  %v796_v63 = vadd.f32 %v794_v41, %v2234_v47 }
 0xa10   :  { %v1421_v45 = vsel %vm1419_vm4, %v1420_v60, %v1418_v37 }
 0xa11   :  { %v1425_v46 = vadd.f32 1e-06, %v1421_v45  ;;  %v811_v49 = vmul.f32 %v1673_v0, %v810_v43  ;;  %v840_v10 = vperm.slane %v796_v63, 0 }
 0xa13   :  { %1674 = vrcp.f32 %v1425_v46  ;;  %v812_v39 = vmul.f32 0.5, %v811_v49  ;;  %v1437_v57 = vand.u32 2147483648, %v1425_v46  ;;  %v1435_v15 = vand.u32 2147483647, %v1425_v46 }
 0xa14   :  { %vm1431_vm8 = vweird.f32 %v1425_v46 }
 0xa15   :  { %v813_v51 = vsub.f32 1.5, %v812_v39  ;;  %v1438_v4 = vor.u32 1.1754944e-38, %v1437_v57  ;;  %vm1436_vm10 = vcmp.eq.f32.partialorder %v1435_v15, 8.507059e+37  ;;  %v1493_v57 = vadd.f32 %v1491_v17, %v2227_v9 }
 0xa17   :  { %v814_v27 = vmul.f32 %v1673_v0, %v813_v51 }
 0xa19   :  { %v1675_v29 = vpop.eup %1674  ;;  %v815_v55 = vmul.f32 %v814_v27, %v808_v5 }
 0xa1a   :  { %v1427_v40 = vmul.f32 %v1675_v29, %v1425_v46  ;;  %vm1432_vm7 = vweird.f32 %v1675_v29 }
 0xa1b   :  { %v817_v52 = vsel %vm816_vm5, %v808_v5, %v815_v55  ;;  %vm1433_vm9 = vmor %vm1431_vm8, %vm1432_vm7 }
 0xa1c   :  { %v820_v38 = vsel %vm818_vm6, %v819_v33, %v817_v52  ;;  %v1428_v58 = vsub.f32 1.0, %v1427_v40 }
 0xa1d   :  { %v824_v53 = vadd.f32 1e-06, %v820_v38 }
 0xa1e   :  { %v1429_v34 = vmul.f32 %v1675_v29, %v1428_v58 }
 0xa1f   :  { %1676 = vrcp.f32 %v824_v53  ;;  %v836_v35 = vand.u32 2147483648, %v824_v53  ;;  %v834_v18 = vand.u32 2147483647, %v824_v53  ;;  %vm830_vm13 = vweird.f32 %v824_v53 }
 0xa20   :  { %v1430_v61 = vadd.f32 %v1675_v29, %v1429_v34 }
 0xa21   :  { %v837_v11 = vor.u32 1.1754944e-38, %v836_v35  ;;  %vm835_vm15 = vcmp.eq.f32.partialorder %v834_v18, 8.507059e+37 }
 0xa22   :  { %v1434_v7 = vsel %vm1433_vm9, %v1675_v29, %v1430_v61  ;;  %v1522_v61 = vperm.slane %v1493_v57, 0 }
 0xa23   :  { %v1439_v30 = vsel %vm1436_vm10, %v1438_v4, %v1434_v7 }
 0xa24   :  { %v1440_v62 = vmul.f32 %v1439_v30, %v1424_v8  ;;  %v1496_v8 = vadd.f32 %v1494_v59, %v2234_v47 }
 0xa25   :  { %v1677_v16 = vpop.eup %1676 }
 0xa26   :  { %v1442_v42 = vadd.f32 %v1441_v44, %v1440_v62  ;;  %v826_v28 = vmul.f32 %v1677_v16, %v824_v53  ;;  %vm831_vm11 = vweird.f32 %v1677_v16  ;;  %v1540_v9 = vperm.slane %v1496_v8, 0 }
 0xa27   :  { %vm832_vm14 = vmor %vm830_vm13, %vm831_vm11 }
 0xa28   :  { %1619 = vmatmul.msk.f32.vlgmr.msrb.gmra.mxu1 %vm120_vm0, %v1442_v42  ;;  %v827_v50 = vsub.f32 1.0, %v826_v28 }
 0xa2a   :  { %v828_v6 = vmul.f32 %v1677_v16, %v827_v50 }
 0xa2c   :  { %v829_v12 = vadd.f32 %v1677_v16, %v828_v6 }
 0xa2e   :  { %v833_v24 = vsel %vm832_vm14, %v1677_v16, %v829_v12 }
 0xa2f   :  { %v838_v14 = vsel %vm835_vm15, %v837_v11, %v833_v24 }
 0xa30   :  { %v839_v5 = vmul.f32 %v838_v14, %v823_v21 }
 0xa32   :  { %v841_v26 = vadd.f32 %v840_v10, %v839_v5 }
 0xa34   :  { %842 = vst.msk [vmem:[#allocation2] sm:$0xff] %vm120_vm0, %v841_v26 }
 0xaa5   :  { %v1463_v22 = vpop.f32.mrf.mxu1 }
 0xaa6   :  { %v1464_v56 = vadd.f32 %v2109_v13, %v1463_v22 }
 0xaa8   :  { %v1466_v20 = vmax.f32 %v1464_v56, 0.0 }
 0xaaa   :  { %1620 = vmatmul.msk.f32.vlgmr.msrb.gmra.mxu2 %vm766_vm12, %v1466_v20 }
 0xb2d   :  { %v1487_v32 = vpop.f32.mrf.mxu2 }
 0xb2e   :  { %v1488_v36 = vadd.f32 %v2189_v3, %v1487_v32 }
 0xb30   :  { %v1490_v0 = vadd.f32 %v1488_v36, %v1442_v42 }
 0xb32   :  { %v1497_v60 = vsel %vm120_vm0, %v1490_v0, 0.0  ;;  %v1500_v37 = vmul.f32 %v1490_v0, %v1490_v0 }
 0xb33   :  { %1498 = vadd.xlane.f32.xlu2 %v1497_v60 }
 0xb34   :  { %v1501_v43 = vsel %vm120_vm0, %v1500_v37, 0.0 }
 0xb3b   :  { %1502 = vadd.xlane.f32.xlu2 %v1501_v43 }
 0xba6   :  { %v1499_v45 = vpop.xlane.xlu2 %1498 }
 0xba7   :  { %v1504_v46 = vmul.f32 0.03125, %v1499_v45 }
 0xba9   :  { %v1505_v49 = vmul.f32 %v1504_v46, %v1499_v45  ;;  %v1521_v2 = vsub.f32 %v1490_v0, %v1504_v46 }
 0xbab   :  { %v1523_v16 = vmul.f32 %v1522_v61, %v1521_v2 }
 0xbae   :  { %v1503_v39 = vpop.xlane.xlu2 %1502 }
 0xbaf   :  { %v1506_v51 = vsub.f32 %v1503_v39, %v1505_v49 }
 0xbb1   :  { %v1507_v13 = vmul.f32 0.032258064, %v1506_v51 }
 0xbb3   :  { %v1508_v27 = vmax.f32 %v1507_v13, 0.0 }
 0xbb5   :  { %1678 = vrsqrt.f32 %v1508_v27  ;;  %vm1516_vm12 = vcmp.eq.f32.partialorder %v1508_v27, inf  ;;  %v1519_v52 = vand.u32 2147483648, %v1508_v27  ;;  %vm1518_vm2 = vcmp.eq.f32.partialorder %v1508_v27, 0.0 }
 0xbbb   :  { %v1679_v29 = vpop.eup %1678 }
 0xbbc   :  { %v1510_v54 = vmul.f32 %v1679_v29, %v1508_v27 }
 0xbbe   :  { %v1511_v55 = vmul.f32 %v1679_v29, %v1510_v54 }
 0xbc0   :  { %v1512_v3 = vmul.f32 0.5, %v1511_v55 }
 0xbc2   :  { %v1513_v23 = vsub.f32 1.5, %v1512_v3 }
 0xbc4   :  { %v1514_v33 = vmul.f32 %v1679_v29, %v1513_v23 }
 0xbc6   :  { %v1515_v40 = vmul.f32 %v1514_v33, %v1508_v27 }
 0xbc8   :  { %v1517_v38 = vsel %vm1516_vm12, %v1508_v27, %v1515_v40 }
 0xbc9   :  { %v1520_v58 = vsel %vm1518_vm2, %v1519_v52, %v1517_v38 }
 0xbca   :  { %v1524_v25 = vadd.f32 1e-06, %v1520_v58 }
 0xbcc   :  { %1680 = vrcp.f32 %v1524_v25  ;;  %v1536_v4 = vand.u32 2147483648, %v1524_v25  ;;  %v1534_v44 = vand.u32 2147483647, %v1524_v25  ;;  %vm1530_vm1 = vweird.f32 %v1524_v25 }
 0xbce   :  { %v1537_v62 = vor.u32 1.1754944e-38, %v1536_v4  ;;  %vm1535_vm5 = vcmp.eq.f32.partialorder %v1534_v44, 8.507059e+37 }
 0xbd2   :  { %v1681_v53 = vpop.eup %1680 }
 0xbd3   :  { %v1526_v34 = vmul.f32 %v1681_v53, %v1524_v25  ;;  %vm1531_vm3 = vweird.f32 %v1681_v53 }
 0xbd4   :  { %vm1532_vm4 = vmor %vm1530_vm1, %vm1531_vm3 }
 0xbd5   :  { %v1527_v15 = vsub.f32 1.0, %v1526_v34 }
 0xbd7   :  { %v1528_v7 = vmul.f32 %v1681_v53, %v1527_v15 }
 0xbd9   :  { %v1529_v30 = vadd.f32 %v1681_v53, %v1528_v7 }
 0xbdb   :  { %v1533_v48 = vsel %vm1532_vm4, %v1681_v53, %v1529_v30 }
 0xbdc   :  { %v1538_v19 = vsel %vm1535_vm5, %v1537_v62, %v1533_v48 }
 0xbdd   :  { %v1539_v41 = vmul.f32 %v1538_v19, %v1523_v16 }
 0xbdf   :  { %v1541_v42 = vadd.f32 %v1540_v9, %v1539_v41 }
 0xbe1   :  { %1543 = vst.msk [vmem:[#allocation2 + $0x8] sm:$0xff] %vm120_vm0, %v1541_v42 }
 0xbe2   :  { %1556 = dma.vmem_to_hbm [thread:$0]  %s1549_s20, 256, %s1551_s23, [#allocation3], %s1711_s24, %s1711_s24, %s1712_s25  }
 0xbe3   :  { %1706 = dma.done.wait [#allocation3], 256  }
 0xbe4   :  { %1707 = vsyncadd [#allocation3], 4294967040 }
 0xbe5   :  { %1561 = vsyncpa [#allocation3], 1 }

</bundles_post_ra>
